<compile_context>
chip_gen: v7x
topology: tpu7x:2x2x1
jax: 0.10.0
libtpu: 0.0.40
codegen_flags: <defaults>
</compile_context>

<pallas_src>
import functools
import math

import jax
import jax.numpy as jnp
from jax.experimental import pallas as pl
from jax.experimental.pallas import tpu as pltpu

MIB = 1024 * 1024
_TAYLOR_TERMS = 9  # truncation ~3e-10 once the scaled norm is <= 0.5


def _num_squarings(features: int) -> int:
    # param ~ U[0,1)  =>  |A_ij| = |p_ij - p_ji| < 1  =>  ||A||_inf < features.
    # Choose s so that ||A / 2^s||_inf <= 0.5.
    # TODO(synk): for params outside [0,1) drive this from an in-kernel
    # ||A||_inf reduction + dynamic lax.fori_loop squaring count.
    return max(0, int(math.ceil(math.log2(max(features, 1)))) + 1)


def _vmem_budget_bytes() -> int:
    """Chip-aware usable-VMEM budget (v7x: ~48 MiB, v5e/v6e: ~96 MiB)."""
    try:
        cap = int(pltpu.get_tpu_info().vmem_capacity_bytes)
    except Exception:
        cap = 64 * MIB  # conservative (v7x physical) if query unavailable
    return int(max(32 * MIB, min(cap - 16 * MIB, 96 * MIB)))


def _tile_rows(n: int, f: int, budget: int) -> int:
    """Rows per x-tile: multi-MiB tiles (amortize per-step overhead), 128-aligned,
    keeping (2 x-in + 2 y-out f32 buffers + bf16 W) under the VMEM budget."""
    w_bytes = 2 * f * f                                # bf16 W, single-buffered
    pipe_budget = max(budget - w_bytes - 4 * MIB, 4 * MIB)
    tile_bytes = min(8 * MIB, pipe_budget // 4)        # 4 live f32 tile buffers
    rows = max(128, (tile_bytes // (4 * f)) // 128 * 128)
    return n if rows >= n else int(rows)


# ---------------------------------------------------------------------------
# expm math (shared): exp(sign * (p - p.T)), f32, HIGHEST-precision matmuls.
# ---------------------------------------------------------------------------
def _expm_f32(p, *, sign: float, squarings: int, taylor_terms: int):
    dot = functools.partial(
        jnp.dot,
        preferred_element_type=jnp.float32,
        precision=jax.lax.Precision.HIGHEST,
    )
    a = (sign / float(2 ** squarings)) * (p - p.T)     # scaled skew generator
    n = a.shape[0]
    inv_fact = [1.0 / math.factorial(k) for k in range(taylor_terms + 1)]
    eye = jnp.eye(n, dtype=jnp.float32)

    # exp(a) ~= E(a^2) + a @ O(a^2): only powers of a^2 are a dependent MXU chain.
    a2 = dot(a, a)
    pwr = a2
    even = eye + pwr * inv_fact[2]
    odd = eye * inv_fact[1]
    if taylor_terms >= 3:
        odd = odd + pwr * inv_fact[3]
    for j in range(2, taylor_terms // 2 + 1):
        pwr = dot(pwr, a2)                             # a2^j
        even = even + pwr * inv_fact[2 * j]
        if 2 * j + 1 <= taylor_terms:
            odd = odd + pwr * inv_fact[2 * j + 1]
    exp_a = even + dot(a, odd)

    for _ in range(squarings):                         # squaring phase
        exp_a = dot(exp_a, exp_a)
    return exp_a


# ---------------------------------------------------------------------------
# Kernel 1: W = exp(sign * (P - P.T)) once, emitted in bf16.
# ---------------------------------------------------------------------------
def _expm_kernel(p_ref, w_ref, *, sign, squarings, taylor_terms):
    w = _expm_f32(p_ref[...].astype(jnp.float32),
                  sign=sign, squarings=squarings, taylor_terms=taylor_terms)
    w_ref[...] = w.astype(w_ref.dtype)  # bf16: halves W HBM traffic + VMEM


# ---------------------------------------------------------------------------
# Kernel 2: y_tile = x_tile @ W   (bf16 MXU, f32 accumulation)
# ---------------------------------------------------------------------------
def _linear_kernel(x_ref, w_ref, o_ref):
    # W arrives already in bf16 (no per-step F^2 cast); only the streamed x
    # tile is cast.
    o_ref[...] = jnp.dot(
        x_ref[...].astype(w_ref.dtype), w_ref[...],
        preferred_element_type=jnp.float32,
    ).astype(o_ref.dtype)


# ---------------------------------------------------------------------------
# Fused kernel (small problems): expm into VMEM scratch on step 0, then matmul.
# ---------------------------------------------------------------------------
def _fused_kernel(p_ref, x_ref, o_ref, w_ref, *, sign, squarings, taylor_terms):
    @pl.when(pl.program_id(0) == 0)
    def _():
        w_ref[...] = _expm_f32(
            p_ref[...].astype(jnp.float32),
            sign=sign, squarings=squarings, taylor_terms=taylor_terms,
        ).astype(w_ref.dtype)

    o_ref[...] = jnp.dot(
        x_ref[...].astype(w_ref.dtype), w_ref[...],
        preferred_element_type=jnp.float32,
    ).astype(o_ref.dtype)


def orthogonal_linear(x, param, inverse: bool = False):
    """x: (N, F) float32, param: (F, F) float32 -> (N, F) float32."""
    N, F = x.shape
    assert param.shape == (F, F)

    # F.linear(x, exp(A)) = x @ exp(A).T = x @ exp(-A)   (A skew-symmetric)
    sign = 1.0 if inverse else -1.0
    squarings = _num_squarings(F)
    budget = _vmem_budget_bytes()
    tile_n = _tile_rows(N, F, budget)
    grid = (pl.cdiv(N, tile_n),)

    fused = (F < 128) or (N * F * 4 <= 256 * 1024)

    if fused:
        # One launch, no W HBM round-trip; W lives in a VMEM scratch computed
        # on grid step 0.  Batch axis must be "arbitrary" so the scratch is
        # valid for every step on the (single) core.
        vmem_need = 40 * F * F + 16 * tile_n * F + 2 * MIB
        return pl.pallas_call(
            functools.partial(_fused_kernel, sign=sign, squarings=squarings,
                              taylor_terms=_TAYLOR_TERMS),
            out_shape=jax.ShapeDtypeStruct((N, F), x.dtype),
            grid_spec=pltpu.PrefetchScalarGridSpec(
                num_scalar_prefetch=0,
                grid=grid,
                in_specs=[
                    pl.BlockSpec((F, F), lambda i: (0, 0)),        # param (resident)
                    pl.BlockSpec((tile_n, F), lambda i: (i, 0)),   # x tile
                ],
                out_specs=pl.BlockSpec((tile_n, F), lambda i: (i, 0)),
                scratch_shapes=[pltpu.VMEM((F, F), jnp.bfloat16)],
            ),
            compiler_params=pltpu.CompilerParams(
                dimension_semantics=("arbitrary",),
                vmem_limit_bytes=int(min(max(vmem_need, 32 * MIB), budget)),
            ),
        )(param, x)

    # --- pass 1: W = exp(sign*(P - P.T)) once, bf16 output ------------------
    expm_need = 36 * F * F + 4 * MIB  # ~live f32 F^2 temporaries + in/out
    # TODO(synk): for F large enough that this exceeds the VMEM budget
    # (~F > 1300 on v7x), tile the expm matmuls with pltpu.emit_pipeline.
    w = pl.pallas_call(
        functools.partial(_expm_kernel, sign=sign, squarings=squarings,
                          taylor_terms=_TAYLOR_TERMS),
        out_shape=jax.ShapeDtypeStruct((F, F), jnp.bfloat16),
        in_specs=[pl.BlockSpec(memory_space=pltpu.MemorySpace.VMEM)],
        out_specs=pl.BlockSpec(memory_space=pltpu.MemorySpace.VMEM),
        compiler_params=pltpu.CompilerParams(
            vmem_limit_bytes=int(min(max(expm_need, 32 * MIB), budget)),
        ),
    )(param)

    # --- pass 2: y = x @ W, batch-tiled; bf16 W resident & single-buffered --
    lin_need = 16 * tile_n * F + 2 * F * F + 4 * MIB
    y = pl.pallas_call(
        _linear_kernel,
        out_shape=jax.ShapeDtypeStruct((N, F), x.dtype),
        grid_spec=pltpu.PrefetchScalarGridSpec(
            num_scalar_prefetch=0,
            grid=grid,
            in_specs=[
                pl.BlockSpec((tile_n, F), lambda i: (i, 0)),       # x tile
                pl.BlockSpec((F, F), lambda i: (0, 0),
                             pipeline_mode=pl.Buffered(1)),        # W, resident
            ],
            out_specs=pl.BlockSpec((tile_n, F), lambda i: (i, 0)),
        ),
        compiler_params=pltpu.CompilerParams(
            dimension_semantics=("parallel",),   # both TCs on megacore parts
            vmem_limit_bytes=int(min(max(lin_need, 32 * MIB), budget)),
        ),
    )(x, w)
    return y


if __name__ == "__main__":
    key = jax.random.PRNGKey(0)
    k_param, k_x, k_param2, k_x2 = jax.random.split(key, 4)

    # --- test 1: module-sized small case (fused path) -----------------------
    features, batch = 32, 8
    param = jax.random.uniform(k_param, (features, features), dtype=jnp.float32)
    x = jax.random.normal(k_x, (batch, features), dtype=jnp.float32)

    y = jax.block_until_ready(orthogonal_linear(x, param, inverse=False))

    with jax.default_matmul_precision("float32"):
        w_ref = jax.scipy.linalg.expm(param - param.T)
        y_ref = x @ w_ref.T
    assert jnp.allclose(y, y_ref, atol=5e-2, rtol=5e-2), "mismatch vs expm reference"

    x_back = jax.block_until_ready(orthogonal_linear(y, param, inverse=True))
    assert jnp.allclose(x_back, x, atol=5e-2, rtol=5e-2), "inverse round-trip failed"

    # --- test 2: exercise the two-kernel (streamed) path ---------------------
    features2, batch2 = 256, 512
    param2 = jax.random.uniform(k_param2, (features2, features2), dtype=jnp.float32)
    x2 = jax.random.normal(k_x2, (batch2, features2), dtype=jnp.float32)

    y2 = jax.block_until_ready(orthogonal_linear(x2, param2, inverse=False))
    with jax.default_matmul_precision("float32"):
        w2_ref = jax.scipy.linalg.expm(param2 - param2.T)
        y2_ref = x2 @ w2_ref.T
    assert jnp.allclose(y2, y2_ref, atol=5e-2, rtol=5e-2), "large-case mismatch"

    print("KERNEL_OK")
</pallas_src>

<mosaic_0001>
module attributes {stable_mosaic.version = 11 : i64} {
  func.func @_fused_kernel(%arg0: i32, %arg1: memref<32x32xf32, #tpu.memory_space<vmem>>, %arg2: memref<8x32xf32, #tpu.memory_space<vmem>>, %arg3: memref<8x32xf32, #tpu.memory_space<vmem>>, %arg4: memref<32x32xbf16, #tpu.memory_space<vmem>>) attributes {dimension_semantics = [#tpu.dimension_semantics<arbitrary>], iteration_bounds = array<i64: 1>, scalar_prefetch = 0 : i64, scratch_operands = 1 : i64, tpu.core_type = #tpu.core_type<tc>, window_params = [{pipeline_mode = #tpu.pipeline_mode<synchronous>, transform_indices = @transform_0, window_bounds = array<i64: 32, 32>}, {transform_indices = @transform_1, window_bounds = array<i64: 8, 32>}, {transform_indices = @transform_2, window_bounds = array<i64: 8, 32>}]} {
    %c0_i32 = arith.constant 0 : i32
    %0 = arith.cmpi eq, %arg0, %c0_i32 : i32
    %1 = arith.extui %0 : i1 to i32
    %c0_i32_0 = arith.constant 0 : i32
    %2 = arith.cmpi ne, %1, %c0_i32_0 : i32
    scf.if %2 {
      %c0_6 = arith.constant 0 : index
      %c0_7 = arith.constant 0 : index
      %8 = vector.load %arg1[%c0_6, %c0_7] : memref<32x32xf32, #tpu.memory_space<vmem>>, vector<32x32xf32>
      %9 = tpu.transpose %8, [1, 0] : vector<32x32xf32> -> vector<32x32xf32>
      %10 = arith.subf %8, %9 : vector<32x32xf32>
      %cst_8 = arith.constant -1.562500e-02 : f32
      %11 = vector.broadcast %cst_8 : f32 to vector<32x32xf32>
      %12 = arith.mulf %11, %10 : vector<32x32xf32>
      %13 = tpu.iota {dimensions = array<i32: 0>} : vector<32x32xi32>
      %14 = tpu.iota {dimensions = array<i32: 1>} : vector<32x32xi32>
      %c0_i32_9 = arith.constant 0 : i32
      %15 = vector.broadcast %c0_i32_9 : i32 to vector<32x32xi32>
      %16 = arith.addi %13, %15 : vector<32x32xi32>
      %17 = arith.cmpi eq, %16, %14 : vector<32x32xi32>
      %18 = arith.extui %17 : vector<32x32xi1> to vector<32x32xi32>
      %19 = arith.sitofp %18 : vector<32x32xi32> to vector<32x32xf32>
      %cst_10 = arith.constant dense<0.000000e+00> : vector<32x32xf32>
      %20 = tpu.matmul %12, %12, %cst_10 {dimension_numbers = #tpu.dot_dimension_numbers<[1], [0], [0], [1], [0, 0, 1, 1], [], []>, precision = #tpu.contract_precision<fp32>} : vector<32x32xf32>, vector<32x32xf32>, vector<32x32xf32> -> vector<32x32xf32>
      %cst_11 = arith.constant 5.000000e-01 : f32
      %21 = vector.broadcast %cst_11 : f32 to vector<32x32xf32>
      %22 = arith.mulf %20, %21 : vector<32x32xf32>
      %23 = arith.addf %19, %22 : vector<32x32xf32>
      %cst_12 = arith.constant 1.000000e+00 : f32
      %24 = vector.broadcast %cst_12 : f32 to vector<32x32xf32>
      %25 = arith.mulf %19, %24 : vector<32x32xf32>
      %cst_13 = arith.constant 0.166666672 : f32
      %26 = vector.broadcast %cst_13 : f32 to vector<32x32xf32>
      %27 = arith.mulf %20, %26 : vector<32x32xf32>
      %28 = arith.addf %25, %27 : vector<32x32xf32>
      %cst_14 = arith.constant dense<0.000000e+00> : vector<32x32xf32>
      %29 = tpu.matmul %20, %20, %cst_14 {dimension_numbers = #tpu.dot_dimension_numbers<[1], [0], [0], [1], [0, 0, 1, 1], [], []>, precision = #tpu.contract_precision<fp32>} : vector<32x32xf32>, vector<32x32xf32>, vector<32x32xf32> -> vector<32x32xf32>
      %cst_15 = arith.constant 0.0416666679 : f32
      %30 = vector.broadcast %cst_15 : f32 to vector<32x32xf32>
      %31 = arith.mulf %29, %30 : vector<32x32xf32>
      %32 = arith.addf %23, %31 : vector<32x32xf32>
      %cst_16 = arith.constant 0.00833333377 : f32
      %33 = vector.broadcast %cst_16 : f32 to vector<32x32xf32>
      %34 = arith.mulf %29, %33 : vector<32x32xf32>
      %35 = arith.addf %28, %34 : vector<32x32xf32>
      %cst_17 = arith.constant dense<0.000000e+00> : vector<32x32xf32>
      %36 = tpu.matmul %29, %20, %cst_17 {dimension_numbers = #tpu.dot_dimension_numbers<[1], [0], [0], [1], [0, 0, 1, 1], [], []>, precision = #tpu.contract_precision<fp32>} : vector<32x32xf32>, vector<32x32xf32>, vector<32x32xf32> -> vector<32x32xf32>
      %cst_18 = arith.constant 0.00138888892 : f32
      %37 = vector.broadcast %cst_18 : f32 to vector<32x32xf32>
      %38 = arith.mulf %36, %37 : vector<32x32xf32>
      %39 = arith.addf %32, %38 : vector<32x32xf32>
      %cst_19 = arith.constant 1.98412701E-4 : f32
      %40 = vector.broadcast %cst_19 : f32 to vector<32x32xf32>
      %41 = arith.mulf %36, %40 : vector<32x32xf32>
      %42 = arith.addf %35, %41 : vector<32x32xf32>
      %cst_20 = arith.constant dense<0.000000e+00> : vector<32x32xf32>
      %43 = tpu.matmul %36, %20, %cst_20 {dimension_numbers = #tpu.dot_dimension_numbers<[1], [0], [0], [1], [0, 0, 1, 1], [], []>, precision = #tpu.contract_precision<fp32>} : vector<32x32xf32>, vector<32x32xf32>, vector<32x32xf32> -> vector<32x32xf32>
      %cst_21 = arith.constant 2.48015876E-5 : f32
      %44 = vector.broadcast %cst_21 : f32 to vector<32x32xf32>
      %45 = arith.mulf %43, %44 : vector<32x32xf32>
      %46 = arith.addf %39, %45 : vector<32x32xf32>
      %cst_22 = arith.constant 2.75573188E-6 : f32
      %47 = vector.broadcast %cst_22 : f32 to vector<32x32xf32>
      %48 = arith.mulf %43, %47 : vector<32x32xf32>
      %49 = arith.addf %42, %48 : vector<32x32xf32>
      %cst_23 = arith.constant dense<0.000000e+00> : vector<32x32xf32>
      %50 = tpu.matmul %12, %49, %cst_23 {dimension_numbers = #tpu.dot_dimension_numbers<[1], [0], [0], [1], [0, 0, 1, 1], [], []>, precision = #tpu.contract_precision<fp32>} : vector<32x32xf32>, vector<32x32xf32>, vector<32x32xf32> -> vector<32x32xf32>
      %51 = arith.addf %46, %50 : vector<32x32xf32>
      %cst_24 = arith.constant dense<0.000000e+00> : vector<32x32xf32>
      %52 = tpu.matmul %51, %51, %cst_24 {dimension_numbers = #tpu.dot_dimension_numbers<[1], [0], [0], [1], [0, 0, 1, 1], [], []>, precision = #tpu.contract_precision<fp32>} : vector<32x32xf32>, vector<32x32xf32>, vector<32x32xf32> -> vector<32x32xf32>
      %cst_25 = arith.constant dense<0.000000e+00> : vector<32x32xf32>
      %53 = tpu.matmul %52, %52, %cst_25 {dimension_numbers = #tpu.dot_dimension_numbers<[1], [0], [0], [1], [0, 0, 1, 1], [], []>, precision = #tpu.contract_precision<fp32>} : vector<32x32xf32>, vector<32x32xf32>, vector<32x32xf32> -> vector<32x32xf32>
      %cst_26 = arith.constant dense<0.000000e+00> : vector<32x32xf32>
      %54 = tpu.matmul %53, %53, %cst_26 {dimension_numbers = #tpu.dot_dimension_numbers<[1], [0], [0], [1], [0, 0, 1, 1], [], []>, precision = #tpu.contract_precision<fp32>} : vector<32x32xf32>, vector<32x32xf32>, vector<32x32xf32> -> vector<32x32xf32>
      %cst_27 = arith.constant dense<0.000000e+00> : vector<32x32xf32>
      %55 = tpu.matmul %54, %54, %cst_27 {dimension_numbers = #tpu.dot_dimension_numbers<[1], [0], [0], [1], [0, 0, 1, 1], [], []>, precision = #tpu.contract_precision<fp32>} : vector<32x32xf32>, vector<32x32xf32>, vector<32x32xf32> -> vector<32x32xf32>
      %cst_28 = arith.constant dense<0.000000e+00> : vector<32x32xf32>
      %56 = tpu.matmul %55, %55, %cst_28 {dimension_numbers = #tpu.dot_dimension_numbers<[1], [0], [0], [1], [0, 0, 1, 1], [], []>, precision = #tpu.contract_precision<fp32>} : vector<32x32xf32>, vector<32x32xf32>, vector<32x32xf32> -> vector<32x32xf32>
      %cst_29 = arith.constant dense<0.000000e+00> : vector<32x32xf32>
      %57 = tpu.matmul %56, %56, %cst_29 {dimension_numbers = #tpu.dot_dimension_numbers<[1], [0], [0], [1], [0, 0, 1, 1], [], []>, precision = #tpu.contract_precision<fp32>} : vector<32x32xf32>, vector<32x32xf32>, vector<32x32xf32> -> vector<32x32xf32>
      %58 = arith.truncf %57 : vector<32x32xf32> to vector<32x32xbf16>
      %c0_30 = arith.constant 0 : index
      %c0_31 = arith.constant 0 : index
      %59 = vector.load %arg4[%c0_30, %c0_31] : memref<32x32xbf16, #tpu.memory_space<vmem>>, vector<32x32xbf16>
      tpu.vector_store %arg4[%c0_30, %c0_31], %58 {strides = array<i32>} : memref<32x32xbf16, #tpu.memory_space<vmem>>, vector<32x32xbf16>,
    } else {
    }
    %c0 = arith.constant 0 : index
    %c0_1 = arith.constant 0 : index
    %3 = vector.load %arg2[%c0, %c0_1] : memref<8x32xf32, #tpu.memory_space<vmem>>, vector<8x32xf32>
    %4 = arith.truncf %3 : vector<8x32xf32> to vector<8x32xbf16>
    %c0_2 = arith.constant 0 : index
    %c0_3 = arith.constant 0 : index
    %5 = vector.load %arg4[%c0_2, %c0_3] : memref<32x32xbf16, #tpu.memory_space<vmem>>, vector<32x32xbf16>
    %cst = arith.constant dense<0.000000e+00> : vector<8x32xf32>
    %6 = tpu.matmul %4, %5, %cst {dimension_numbers = #tpu.dot_dimension_numbers<[1], [0], [0], [1], [0, 0, 1, 1], [], []>} : vector<8x32xbf16>, vector<32x32xbf16>, vector<8x32xf32> -> vector<8x32xf32>
    %c0_4 = arith.constant 0 : index
    %c0_5 = arith.constant 0 : index
    %7 = vector.load %arg3[%c0_4, %c0_5] : memref<8x32xf32, #tpu.memory_space<vmem>>, vector<8x32xf32>
    tpu.vector_store %arg3[%c0_4, %c0_5], %6 {strides = array<i32>} : memref<8x32xf32, #tpu.memory_space<vmem>>, vector<8x32xf32>,
    return
  }
  func.func @transform_0(%arg0: i32) -> (i32, i32) {
    %c0_i32 = arith.constant 0 : i32
    %c0_i32_0 = arith.constant 0 : i32
    %c0_i32_1 = arith.constant 0 : i32
    return %c0_i32, %c0_i32_0 : i32, i32
  }
  func.func @transform_1(%arg0: i32) -> (i32, i32) {
    %c0_i32 = arith.constant 0 : i32
    %c0_i32_0 = arith.constant 0 : i32
    return %arg0, %c0_i32 : i32, i32
  }
  func.func @transform_2(%arg0: i32) -> (i32, i32) {
    %c0_i32 = arith.constant 0 : i32
    %c0_i32_0 = arith.constant 0 : i32
    return %arg0, %c0_i32 : i32, i32
  }
}

</mosaic_0001>

<bundles_post_ra>
// kernel: tpu_custom_call.1
= control target key start
LH: loop header
LB: loop body
LE: loop exit
PB: predicated region body
PF: predicated region fallthrough
CT: control target
= control target key end

     0   :  { %7 = vsyncpa [#allocation4], 0  ;;  %s10272_s0 = inlined_call_operand.hbm [shape: f32[32,32], index: 0, kind: input, shape index: {}]   ;;  %s10273_s1 = inlined_call_operand.hbm [shape: f32[8,32], index: 1, kind: input, shape index: {}]   ;;  %s10274_s2 = inlined_call_operand.hbm [shape: f32[8,32], index: 2, kind: output, shape index: {}]  }
   0x1   :  { %8 = vsyncpa [#allocation7], 0 }
   0x2   :  { %9 = vsyncpa [#allocation5], 0  ;;  %s9413_s9 = smov [#allocation3]   ;;  %s9341_s13 = scalar_lea.hbm %s10272_s0, 512 }
   0x3   :  { %s15_s10 = sshll.u32 %s9413_s9, 4  ;;  %p9342_p0 = scmp.ne.s32.totalorder %s10272_s0, %s9341_s13  ;;  %s16_s10 = int_to_ptr.vmem [resolvable:$true] %s15_s10 }
   0x4   :  { %p9345_p1 = scmp.lt.u32.totalorder %s9341_s13, %s10272_s0 }
   0x6   :  { %p9347_p2 = pnand %p9345_p1, %p9342_p0 }
   0x8   :  { %9350 = shalt.err (!%p9347_p2)
}
   0x9   :  { %s9351_s18 = scalar_lea.vmem %s16_s10, 512  ;;  %p9356_p4 = scmp.lt.s32.totalorder %s16_s10, %s16_s10 }
   0xa   :  { %p9352_p3 = scmp.ne.s32.totalorder %s16_s10, %s9351_s18  ;;  %p9357_p5 = scmp.lt.s32.totalorder %s9351_s18, %s9351_s18 }
   0xc   :  { %p9358_p6 = por %p9357_p5, %p9356_p4 }
   0xe   :  { %p9359_p7 = pnand %p9358_p6, %p9352_p3 }
  0x10   :  { %9362 = shalt.err (!%p9359_p7)
}
  0x11   :  { %s9414_s19 = smov 128   ;;  %s9415_s20 = smov 8  }
  0x12   :  { %21 = dma.hbm_to_vmem [thread:$0]  %s10272_s0, 512, %s16_s10, [#allocation4], %s9414_s19, %s9414_s19, %s9415_s20  }
  0x13   :  { %s9416_s23 = smov [#allocation6]   ;;  %s9363_s27 = scalar_lea.hbm %s10273_s1, 128 }
  0x14   :  { %s28_s24 = sshll.u32 %s9416_s23, 4  ;;  %p9364_p8 = scmp.ne.s32.totalorder %s10273_s1, %s9363_s27  ;;  %s29_s24 = int_to_ptr.vmem [resolvable:$true] %s28_s24 }
  0x15   :  { %p9367_p9 = scmp.lt.u32.totalorder %s9363_s27, %s10273_s1 }
  0x17   :  { %p9369_p10 = pnand %p9367_p9, %p9364_p8 }
  0x19   :  { %9372 = shalt.err (!%p9369_p10)
}
  0x1a   :  { %s9373_s4 = scalar_lea.vmem %s29_s24, 128  ;;  %p9378_p12 = scmp.lt.s32.totalorder %s29_s24, %s29_s24 }
  0x1b   :  { %p9374_p11 = scmp.ne.s32.totalorder %s29_s24, %s9373_s4  ;;  %p9379_p13 = scmp.lt.s32.totalorder %s9373_s4, %s9373_s4 }
  0x1d   :  { %p9380_p0 = por %p9379_p13, %p9378_p12 }
  0x1f   :  { %p9381_p1 = pnand %p9380_p0, %p9374_p11 }
  0x21   :  { %9384 = shalt.err (!%p9381_p1)
}
  0x22   :  { %31 = dma.hbm_to_vmem [thread:$0]  %s10273_s1, 128, %s29_s24, [#allocation7]  }
  0x23   :  { %9407 = dma.done.wait [#allocation4], 512  }
  0x24   :  { %9408 = vsyncadd [#allocation4], 4294966784 }
  0x25   :  { %9409 = dma.done.wait [#allocation7], 128  }
  0x26   :  { %9410 = vsyncadd [#allocation7], 4294967168  ;;  %v43_v0 = vld [vmem:[#allocation3] sm:$0xff]  ;;  %v44_v1 = vld [vmem:[#allocation3 + $0x8] sm:$0xff]  ;;  %vm106_vm0 = vcmask 261120   ;;  %vm9418_vm5 = vmmov 0  }
  0x27   :  { %47 = vxpose.xlu0.b32.start [1/4] (short) (narrow) %v43_v0, 32  ;;  %v45_v2 = vld [vmem:[#allocation3 + $0x10] sm:$0xff]  ;;  %v46_v3 = vld [vmem:[#allocation3 + $0x18] sm:$0xff]  ;;  %s9419_s1 = smov [#allocation8]  }
  0x28   :  { %s7108_s6 = sshll.u32 %s9419_s1, 4  ;;  %s7109_s6 = int_to_ptr.vmem [resolvable:$true] %s7108_s6 }
  0x29   :  { %s9385_s7 = scalar_lea.vmem %s7109_s6, 128  ;;  %p9390_p3 = scmp.lt.s32.totalorder %s7109_s6, %s7109_s6 }
  0x2a   :  { %p9386_p2 = scmp.ne.s32.totalorder %s7109_s6, %s9385_s7  ;;  %p9391_p4 = scmp.lt.s32.totalorder %s9385_s7, %s9385_s7 }
  0x2b   :  { %48 = vxpose.xlu0.b32.cont [2/4] (short) (narrow) %v44_v1, 32 }
  0x2c   :  { %p9392_p5 = por %p9391_p4, %p9390_p3 }
  0x2e   :  { %p9393_p6 = pnand %p9392_p5, %p9386_p2 }
  0x2f   :  { %49 = vxpose.xlu0.b32.cont [3/4] (short) (narrow) %v45_v2, 32 }
  0x33   :  { %50 = vxpose.xlu0.b32.end [4/4] (short) (narrow) %v46_v3, 32 }
  0xa7   :  { %v63_v4 = vpop.trf.xlu0 }
  0xa8   :  { %v79_v5 = vsub.f32 %v43_v0, %v63_v4 }
  0xaa   :  { %v83_v6 = vmul.f32 -0.015625, %v79_v5 }
  0xab   :  { %v64_v7 = vpop.trf.xlu0 }
  0xac   :  { %v108_v8 = vsel %vm106_vm0, %v83_v6, 0  ;;  %v120_v9 = vand.u32 4294901760, %v83_v6  ;;  %v80_v10 = vsub.f32 %v44_v1, %v64_v7 }
  0xad   :  { %v9460_v11 = vand.u32 4294901760, %v108_v8 }
  0xae   :  { %v9462_v12 = vsub.f32 %v83_v6, %v120_v9  ;;  %v84_v13 = vmul.f32 -0.015625, %v80_v10 }
  0xaf   :  { %v9465_v14 = vsub.f32 %v108_v8, %v9460_v11  ;;  %v65_v15 = vpop.trf.xlu0  ;;  %v87_v8 = vlaneseq }
  0xb0   :  { %v111_v16 = vsel %vm106_vm0, %v84_v13, 0  ;;  %v123_v17 = vand.u32 4294901760, %v84_v13  ;;  %v81_v18 = vsub.f32 %v45_v2, %v65_v15  ;;  %v231_v24 = vand.u32 4294901760, %v9462_v12 }
  0xb1   :  { %v9468_v19 = vand.u32 4294901760, %v111_v16  ;;  %7690 = vmatprep.mubr.f32.mxu0 %v9465_v14  ;;  %v9472_v20 = vand.u32 4294901760, %v9465_v14 }
  0xb2   :  { %v9474_v21 = vpack.c.bf16 %v123_v17, %v120_v9  ;;  %v9476_v22 = vsub.f32 %v84_v13, %v123_v17  ;;  %v85_v23 = vmul.f32 -0.015625, %v81_v18  ;;  %v232_v37 = vsub.f32 %v9462_v12, %v231_v24 }
  0xb3   :  { %v9480_v25 = vsub.f32 %v111_v16, %v9468_v19  ;;  %v66_v26 = vpop.trf.xlu0  ;;  %v191_v27 = vsub.f32 %v9465_v14, %v9472_v20  ;;  %v88_v9 = vshrl.u32 %v87_v8, 7 }
  0xb4   :  { %v114_v28 = vsel %vm106_vm0, %v85_v23, 0  ;;  %v126_v29 = vand.u32 4294901760, %v85_v23  ;;  %v82_v30 = vsub.f32 %v46_v3, %v66_v26  ;;  %8587 = vmatprep.subr.bf16.mxu1 %v9474_v21  ;;  %v8602_v31 = vpack.c.bf16 %v9476_v22, %v9462_v12 }
  0xb5   :  { %v9488_v32 = vand.u32 4294901760, %v114_v28  ;;  %8589 = vmatpush3.bf16.msra.mxu1 %v9474_v21  ;;  %v9491_v33 = vand.u32 4294901760, %v191_v27  ;;  %v238_v34 = vand.u32 4294901760, %v9476_v22  ;;  %v9498_v38 = vand.u32 4294901760, %v9480_v25 }
  0xb6   :  { %v244_v35 = vsub.f32 %v85_v23, %v126_v29  ;;  %v86_v36 = vmul.f32 -0.015625, %v82_v30  ;;  %8603 = vmatprep.subr.bf16.mxu0 %v8602_v31  ;;  %v233_v49 = vand.u32 4294901760, %v232_v37  ;;  %v89_v10 = vadd.s32 8, %v88_v9 }
  0xb7   :  { %v9501_v39 = vsub.f32 %v114_v28, %v9488_v32  ;;  %7662 = vmatprep.mubr.f32.mxu1 %v9491_v33  ;;  %8605 = vmatpush3.bf16.msra.mxu0 %v8602_v31  ;;  %v239_v40 = vsub.f32 %v9476_v22, %v238_v34  ;;  %v201_v50 = vsub.f32 %v9480_v25, %v9498_v38  ;;  %v9557_v12 = vand.u32 127, %v87_v8 }
  0xb8   :  { %v117_v41 = vsel %vm106_vm0, %v86_v36, 0  ;;  %v129_v42 = vand.u32 4294901760, %v86_v36  ;;  %v245_v43 = vand.u32 4294901760, %v244_v35  ;;  %v8618_v2 = vpack.c.bf16 %v238_v34, %v231_v24 }
  0xb9   :  { %v9506_v44 = vand.u32 4294901760, %v117_v41  ;;  %v240_v45 = vand.u32 4294901760, %v239_v40  ;;  %v9509_v46 = vand.u32 4294901760, %v9501_v39  ;;  %v9521_v58 = vand.u32 4294901760, %v201_v50 }
  0xba   :  { %v8590_v47 = vpack.c.bf16 %v129_v42, %v126_v29  ;;  %v251_v48 = vsub.f32 %v86_v36, %v129_v42  ;;  %v246_v55 = vsub.f32 %v244_v35, %v245_v43  ;;  %vm95_vm1 = vcmp.eq.s32.totalorder %v89_v10, %v9557_v12 }
  0xbb   :  { %v9514_v51 = vsub.f32 %v117_v41, %v9506_v44  ;;  %v211_v52 = vsub.f32 %v9501_v39, %v9509_v46  ;;  %v8594_v53 = vpack.c.bf16 %v240_v45, %v233_v49  ;;  %vm94_vm2 = vcmp.eq.s32.totalorder %v88_v9, %v9557_v12 }
  0xbc   :  { %8591 = vmatprep.subr.bf16.mxu1 %v8590_v47  ;;  %v8606_v54 = vpack.c.bf16 %v251_v48, %v244_v35  ;;  %v252_v56 = vand.u32 4294901760, %v251_v48  ;;  %v247_v62 = vand.u32 4294901760, %v246_v55  ;;  %v9563_v17 = vadd.s32 24, %v88_v9 }
  0xbd   :  { %8593 = vmatpush3.bf16.msra.mxu1 %v8590_v47  ;;  %v9519_v57 = vand.u32 4294901760, %v9514_v51  ;;  %v9523_v60 = vand.u32 4294901760, %v211_v52  ;;  %v9570_v23 = vadd.s32 16, %v88_v9 }
  0xbe   :  { %8595 = vmatprep.subr.bf16.mxu1 %v8594_v53  ;;  %8607 = vmatprep.subr.bf16.mxu0 %v8606_v54  ;;  %v253_v59 = vsub.f32 %v251_v48, %v252_v56  ;;  %v8622_v3 = vpack.c.bf16 %v252_v56, %v245_v43  ;;  %vm97_vm3 = vcmp.eq.s32.totalorder %v9563_v17, %v9557_v12 }
  0xbf   :  { %8609 = vmatpush3.bf16.msra.mxu0 %v8606_v54  ;;  %v221_v61 = vsub.f32 %v9514_v51, %v9519_v57  ;;  %vm96_vm4 = vcmp.eq.s32.totalorder %v9570_v23, %v9557_v12 }
  0xc0   :  { %7663 = vmatmul.mubr.f32.vlgmr.msra.gmra.mrb[0].mxu1 %v9521_v58  ;;  %8611 = vmatprep.subr.bf16.mxu0 %v9474_v21  ;;  %v254_v63 = vand.u32 4294901760, %v253_v59 }
  0xc1   :  { %7665 = vmatprep.mubr.f32.mxu1 %v9523_v60  ;;  %8597 = vmatpush3.bf16.msra.mxu1 %v8594_v53  ;;  %v9530_v0 = vand.u32 4294901760, %v221_v61 }
  0xc2   :  { %7691 = vmatmul.mubr.f32.vlgmr.msra.gmra.mrb[0].mxu0 %v9480_v25  ;;  %v8598_v1 = vpack.c.bf16 %v254_v63, %v247_v62 }
  0xc3   :  { %7693 = vmatprep.mubr.f32.mxu0 %v9501_v39  ;;  %8613 = vmatpush3.bf16.msra.mxu0 %v9474_v21 }
  0xc4   :  { %7666 = vmatmul.mubr.f32.gmra.mrb[2].mxu1 %v9530_v0  ;;  %8599 = vmatprep.subr.bf16.mxu1 %v8598_v1 }
  0xc5   :  { %8615 = vmatprep.subr.bf16.mxu0 %v8590_v47  ;;  %8601 = vmatpush3.bf16.msra.mxu1 %v8598_v1 }
  0xc6   :  { %7676 = vmatprep.mubr.f32.mxu1 %v9460_v11  ;;  %7694 = vmatmul.mubr.f32.gmra.mrb[2].mxu0 %v9514_v51 }
  0xc7   :  { %8617 = vmatpush3.bf16.msra.mxu0 %v8590_v47  ;;  %7704 = vmatprep.mubr.f32.mxu0 %v9472_v20 }
  0xc8   :  { %7677 = vmatmul.mubr.f32.vlgmr.msra.gmra.mrb[0].mxu1 %v9468_v19  ;;  %8619 = vmatprep.subr.bf16.mxu0 %v8618_v2 }
  0xc9   :  { %7679 = vmatprep.mubr.f32.mxu1 %v9488_v32 }
  0xca   :  { %7705 = vmatmul.mubr.f32.vlgmr.msra.gmra.mrb[0].mxu0 %v9498_v38 }
  0xcb   :  { %7707 = vmatprep.mubr.f32.mxu0 %v9509_v46  ;;  %8621 = vmatpush3.bf16.msra.mxu0 %v8618_v2 }
  0xcc   :  { %7680 = vmatmul.mubr.f32.gmra.mrb[2].mxu1 %v9506_v44  ;;  %8623 = vmatprep.subr.bf16.mxu0 %v8622_v3 }
  0xce   :  { %7708 = vmatmul.mubr.f32.gmra.mrb[2].mxu0 %v9519_v57 }
  0xcf   :  { %8625 = vmatpush3.bf16.msra.mxu0 %v8622_v3  ;;  %7718 = vmatprep.mubr.f32.mxu0 %v9460_v11 }
  0xd0   :  { %8627 = vmatprep.subr.bf16.mxu0 %v9474_v21 }
  0xd2   :  { %7719 = vmatmul.mubr.f32.vlgmr.msra.gmra.mrb[0].mxu0 %v9468_v19 }
  0xd3   :  { %7721 = vmatprep.mubr.f32.mxu0 %v9488_v32  ;;  %8629 = vmatpush3.bf16.msra.mxu0 %v9474_v21  ;;  %v9417_v21 = vmov 0.0  }
  0xd4   :  { %8631 = vmatprep.subr.bf16.mxu0 %v8590_v47  ;;  %v9568_v22 = vsel %vm95_vm1, 1.0, %v9417_v21  ;;  %v9577_v28 = vsel %vm94_vm2, 1.0, %v9417_v21 }
  0xd6   :  { %7722 = vmatmul.mubr.f32.gmra.mrb[2].mxu0 %v9506_v44 }
  0xd7   :  { %8633 = vmatpush3.bf16.msra.mxu0 %v8590_v47  ;;  %7732 = vmatprep.mubr.f32.mxu0 %v9460_v11 }
  0xda   :  { %7733 = vmatmul.mubr.f32.vlgmr.msra.gmra.mrb[0].mxu0 %v9468_v19 }
  0xdb   :  { %7735 = vmatprep.mubr.f32.mxu0 %v9488_v32 }
  0xde   :  { %7736 = vmatmul.mubr.f32.gmra.mrb[2].mxu0 %v9506_v44 }
 0x19b   :  { %v7678_v4 = vpop.f32.mrb[0].mxu1 }
 0x19c   :  { %v315_v5 = vpop.f32.mrb[1].mxu1 }
 0x19f   :  { %v7681_v6 = vpop.f32.mrb[2].mxu1 }
 0x1a0   :  { %v327_v7 = vpop.f32.mrb[3].mxu1 }
 0x1ad   :  { %v7734_v13 = vpop.f32.mrb[0].mxu0 }
 0x1ae   :  { %v9561_v15 = vadd.f32 %v7734_v13, %v7678_v4  ;;  %v711_v16 = vpop.f32.mrb[1].mxu0 }
 0x1af   :  { %v9565_v18 = vadd.f32 %v711_v16, %v315_v5 }
 0x1b0   :  { %v753_v24 = vsel %vm106_vm0, %v9561_v15, 0  ;;  %v765_v26 = vand.u32 4294901760, %v9561_v15  ;;  %v734_v27 = vmul.f32 0.5, %v9561_v15  ;;  %v742_v23 = vmul.f32 0.16666667, %v9561_v15 }
 0x1b1   :  { %v9579_v29 = vand.u32 4294901760, %v753_v24  ;;  %v762_v30 = vand.u32 4294901760, %v9565_v18  ;;  %v7737_v31 = vpop.f32.mrb[2].mxu0  ;;  %v750_v34 = vsel %vm106_vm0, %v9565_v18, 0  ;;  %v733_v35 = vmul.f32 0.5, %v9565_v18 }
 0x1b2   :  { %v879_v36 = vsub.f32 %v9561_v15, %v765_v26  ;;  %v9586_v37 = vadd.f32 %v7737_v31, %v7681_v6  ;;  %v723_v40 = vpop.f32.mrb[3].mxu0  ;;  %v9588_v41 = vand.u32 4294901760, %v750_v34  ;;  %v9591_v42 = vadd.f32 %v9568_v22, %v734_v27 }
 0x1b3   :  { %v9596_v43 = vsub.f32 %v753_v24, %v9579_v29  ;;  %v9598_v45 = vpack.c.bf16 %v765_v26, %v762_v30  ;;  %v872_v47 = vsub.f32 %v9565_v18, %v762_v30  ;;  %v9601_v48 = vadd.f32 %v723_v40, %v327_v7 }
 0x1b4   :  { %v880_v49 = vand.u32 4294901760, %v879_v36  ;;  %v771_v50 = vand.u32 4294901760, %v9586_v37  ;;  %v9607_v52 = vsub.f32 %v750_v34, %v9588_v41  ;;  %v759_v53 = vsel %vm106_vm0, %v9586_v37, 0 }
 0x1b5   :  { %v873_v54 = vand.u32 4294901760, %v872_v47  ;;  %v768_v55 = vand.u32 4294901760, %v9601_v48  ;;  %8635 = vmatprep.subr.bf16.mxu1 %v9598_v45  ;;  %8683 = vmatprep.subr.bf16.mxu0 %v9598_v45  ;;  %v10275_v56 = vand.u32 4294901760, %v9596_v43  ;;  %v756_v59 = vsel %vm106_vm0, %v9601_v48, 0 }
 0x1b6   :  { %v881_v61 = vsub.f32 %v879_v36, %v880_v49  ;;  %v893_v62 = vsub.f32 %v9586_v37, %v771_v50  ;;  %8637 = vmatpush3.bf16.msra.mxu1 %v9598_v45  ;;  %8685 = vmatpush3.bf16.msra.mxu0 %v9598_v45  ;;  %v832_v63 = vand.u32 4294901760, %v9607_v52  ;;  %v9621_v1 = vand.u32 4294901760, %v756_v59 }
 0x1b7   :  { %v874_v2 = vsub.f32 %v872_v47, %v873_v54  ;;  %v9623_v3 = vpack.c.bf16 %v771_v50, %v768_v55  ;;  %v886_v4 = vsub.f32 %v9601_v48, %v768_v55  ;;  %v843_v5 = vsub.f32 %v9596_v43, %v10275_v56 }
 0x1b8   :  { %v882_v6 = vand.u32 4294901760, %v881_v61  ;;  %v894_v7 = vand.u32 4294901760, %v893_v62  ;;  %v833_v8 = vsub.f32 %v9607_v52, %v832_v63  ;;  %v851_v9 = vsub.f32 %v756_v59, %v9621_v1 }
 0x1b9   :  { %v875_v10 = vand.u32 4294901760, %v874_v2  ;;  %v887_v13 = vand.u32 4294901760, %v886_v4  ;;  %8639 = vmatprep.subr.bf16.mxu1 %v9623_v3  ;;  %8687 = vmatprep.subr.bf16.mxu0 %v9623_v3  ;;  %v844_v16 = vand.u32 4294901760, %v843_v5  ;;  %v9635_v24 = vand.u32 4294901760, %v759_v53 }
 0x1ba   :  { %v895_v26 = vsub.f32 %v893_v62, %v894_v7  ;;  %8641 = vmatpush3.bf16.msra.mxu1 %v9623_v3  ;;  %8689 = vmatpush3.bf16.msra.mxu0 %v9623_v3  ;;  %v834_v27 = vand.u32 4294901760, %v833_v8  ;;  %v852_v30 = vand.u32 4294901760, %v851_v9  ;;  %v9639_v31 = vpack.c.bf16 %v879_v36, %v872_v47 }
 0x1bb   :  { %v888_v34 = vsub.f32 %v886_v4, %v887_v13  ;;  %v9641_v40 = vpack.c.bf16 %v882_v6, %v875_v10  ;;  %v861_v50 = vsub.f32 %v759_v53, %v9635_v24  ;;  %v9644_v55 = vpack.c.bf16 %v893_v62, %v886_v4 }
 0x1bc   :  { %v896_v59 = vand.u32 4294901760, %v895_v26  ;;  %7746 = vmatprep.mubr.f32.mxu1 %v834_v27  ;;  %v853_v61 = vsub.f32 %v851_v9, %v852_v30  ;;  %v9646_v2 = vpack.c.bf16 %v880_v49, %v873_v54  ;;  %v9648_v5 = vpack.c.bf16 %v894_v7, %v887_v13 }
 0x1bd   :  { %v889_v56 = vand.u32 4294901760, %v888_v34  ;;  %7747 = vmatmul.mubr.f32.vlgmr.msra.gmra.mrb[4].mxu1 %v844_v16  ;;  %8643 = vmatprep.subr.bf16.mxu1 %v9641_v40  ;;  %v862_v36 = vand.u32 4294901760, %v861_v50  ;;  %v9652_v47 = vadd.f32 %v9577_v28, %v733_v35  ;;  %v9658_v53 = vsel %vm97_vm3, 1.0, %v9417_v21 }
 0x1be   :  { %8691 = vmatprep.subr.bf16.mxu0 %v9641_v40  ;;  %8645 = vmatpush3.bf16.msra.mxu1 %v9641_v40  ;;  %v854_v49 = vand.u32 4294901760, %v853_v61  ;;  %v736_v54 = vmul.f32 0.5, %v9586_v37  ;;  %v9667_v62 = vsel %vm96_vm4, 1.0, %v9417_v21  ;;  %v735_v17 = vmul.f32 0.5, %v9601_v48 }
 0x1bf   :  { %v863_v35 = vsub.f32 %v861_v50, %v862_v36  ;;  %v9669_v4 = vpack.c.bf16 %v896_v59, %v889_v56  ;;  %v10276_v12 = vand.u32 4294901760, %v9596_v43  ;;  %v743_v56 = vmul.f32 0.16666667, %v9601_v48 }
 0x1c0   :  { %7749 = vmatprep.mubr.f32.mxu1 %v854_v49  ;;  %v9673_v6 = vadd.f32 %v9658_v53, %v736_v54  ;;  %v9677_v8 = vadd.f32 %v9667_v62, %v735_v17 }
 0x1c1   :  { %v864_v7 = vand.u32 4294901760, %v863_v35  ;;  %8647 = vmatprep.subr.bf16.mxu1 %v9669_v4 }
 0x1c2   :  { %8649 = vmatpush3.bf16.msra.mxu1 %v9669_v4 }
 0x1c3   :  { %7750 = vmatmul.mubr.f32.gmra.mrb[6].mxu1 %v864_v7  ;;  %8651 = vmatprep.subr.bf16.mxu1 %v9639_v31 }
 0x1c4   :  { %7760 = vmatprep.mubr.f32.mxu1 %v9588_v41 }
 0x1c7   :  { %7761 = vmatmul.mubr.f32.vlgmr.msra.gmra.mrb[4].mxu1 %v9579_v29 }
 0x1c8   :  { %7763 = vmatprep.mubr.f32.mxu1 %v9621_v1  ;;  %8653 = vmatpush3.bf16.msra.mxu1 %v9639_v31 }
 0x1c9   :  { %8655 = vmatprep.subr.bf16.mxu1 %v9644_v55 }
 0x1cb   :  { %7764 = vmatmul.mubr.f32.gmra.mrb[6].mxu1 %v9635_v24 }
 0x1cc   :  { %8657 = vmatpush3.bf16.msra.mxu1 %v9644_v55  ;;  %7774 = vmatprep.mubr.f32.mxu1 %v9607_v52 }
 0x1cd   :  { %8659 = vmatprep.subr.bf16.mxu1 %v9598_v45 }
 0x1cf   :  { %7775 = vmatmul.mubr.f32.vlgmr.msra.gmra.mrb[4].mxu1 %v9596_v43  ;;  %v744_v43 = vmul.f32 0.16666667, %v9586_v37 }
 0x1d0   :  { %7777 = vmatprep.mubr.f32.mxu1 %v851_v9  ;;  %8661 = vmatpush3.bf16.msra.mxu1 %v9598_v45 }
 0x1d1   :  { %8663 = vmatprep.subr.bf16.mxu1 %v9623_v3  ;;  %v748_v48 = vadd.f32 %v9658_v53, %v744_v43 }
 0x1d3   :  { %7778 = vmatmul.mubr.f32.gmra.mrb[6].mxu1 %v861_v50  ;;  %v747_v50 = vadd.f32 %v9667_v62, %v743_v56 }
 0x1d4   :  { %8665 = vmatpush3.bf16.msra.mxu1 %v9623_v3  ;;  %7788 = vmatprep.mubr.f32.mxu1 %v832_v63 }
 0x1d5   :  { %8667 = vmatprep.subr.bf16.mxu1 %v9646_v2 }
 0x1d7   :  { %7789 = vmatmul.mubr.f32.vlgmr.msra.gmra.mrb[4].mxu1 %v10276_v12 }
 0x1d8   :  { %7791 = vmatprep.mubr.f32.mxu1 %v852_v30  ;;  %8669 = vmatpush3.bf16.msra.mxu1 %v9646_v2 }
 0x1d9   :  { %8671 = vmatprep.subr.bf16.mxu1 %v9648_v5 }
 0x1db   :  { %7792 = vmatmul.mubr.f32.gmra.mrb[6].mxu1 %v862_v36 }
 0x1dc   :  { %8673 = vmatpush3.bf16.msra.mxu1 %v9648_v5  ;;  %7802 = vmatprep.mubr.f32.mxu1 %v9588_v41 }
 0x1dd   :  { %8675 = vmatprep.subr.bf16.mxu1 %v9598_v45 }
 0x1df   :  { %7803 = vmatmul.mubr.f32.vlgmr.msra.gmra.mrb[4].mxu1 %v9579_v29 }
 0x1e0   :  { %7805 = vmatprep.mubr.f32.mxu1 %v9621_v1  ;;  %8677 = vmatpush3.bf16.msra.mxu1 %v9598_v45 }
 0x1e1   :  { %8679 = vmatprep.subr.bf16.mxu1 %v9623_v3 }
 0x1e3   :  { %7806 = vmatmul.mubr.f32.gmra.mrb[6].mxu1 %v9635_v24 }
 0x1e4   :  { %8681 = vmatpush3.bf16.msra.mxu1 %v9623_v3  ;;  %7816 = vmatprep.mubr.f32.mxu1 %v9588_v41  ;;  %v741_v41 = vmul.f32 0.16666667, %v9565_v18 }
 0x1e5   :  { %8731 = vmatprep.subr.bf16.mxu1 %v9598_v45 }
 0x1e6   :  { %v745_v10 = vadd.f32 %v9577_v28, %v741_v41 }
 0x1e7   :  { %7817 = vmatmul.mubr.f32.vlgmr.msra.gmra.mrb[4].mxu1 %v9579_v29  ;;  %v746_v29 = vadd.f32 %v9568_v22, %v742_v23 }
 0x1e8   :  { %7819 = vmatprep.mubr.f32.mxu1 %v9621_v1  ;;  %8733 = vmatpush3.bf16.msra.mxu1 %v9598_v45 }
 0x1e9   :  { %8735 = vmatprep.subr.bf16.mxu1 %v9623_v3 }
 0x1eb   :  { %7820 = vmatmul.mubr.f32.gmra.mrb[6].mxu1 %v9635_v24 }
 0x1ec   :  { %8737 = vmatpush3.bf16.msra.mxu1 %v9623_v3 }
 0x1ed   :  { %8739 = vmatprep.subr.bf16.mxu1 %v9641_v40 }
 0x2ba   :  { %v7818_v52 = vpop.f32.mrb[4].mxu1 }
 0x2bb   :  { %v1376_v63 = vmul.f32 0.041666668, %v7818_v52  ;;  %v1384_v1 = vmul.f32 0.008333334, %v7818_v52  ;;  %v1395_v9 = vsel %vm106_vm0, %v7818_v52, 0  ;;  %v1353_v13 = vpop.f32.mrb[5].mxu1 }
 0x2bc   :  { %v9726_v16 = vand.u32 4294901760, %v1395_v9  ;;  %v1375_v24 = vmul.f32 0.041666668, %v1353_v13  ;;  %v1383_v15 = vmul.f32 0.008333334, %v1353_v13  ;;  %v1392_v18 = vsel %vm106_vm0, %v1353_v13, 0 }
 0x2bd   :  { %v9730_v37 = vadd.f32 %v1376_v63, %v9591_v42  ;;  %v9732_v22 = vadd.f32 %v1384_v1, %v746_v29  ;;  %v9734_v26 = vand.u32 4294901760, %v1392_v18 }
 0x2be   :  { %v1483_v27 = vsub.f32 %v1395_v9, %v9726_v16  ;;  %v9739_v28 = vadd.f32 %v1375_v24, %v9652_v47  ;;  %v9741_v30 = vadd.f32 %v1383_v15, %v745_v10  ;;  %v7821_v34 = vpop.f32.mrb[6].mxu1 }
 0x2bf   :  { %v1473_v59 = vsub.f32 %v1392_v18, %v9734_v26  ;;  %v1378_v42 = vmul.f32 0.041666668, %v7821_v34  ;;  %v1386_v61 = vmul.f32 0.008333334, %v7821_v34  ;;  %v1401_v36 = vsel %vm106_vm0, %v7821_v34, 0  ;;  %v1365_v49 = vpop.f32.mrb[7].mxu1 }
 0x2c0   :  { %v1484_v54 = vand.u32 4294901760, %v1483_v27  ;;  %v9746_v35 = vand.u32 4294901760, %v1401_v36  ;;  %v1377_v53 = vmul.f32 0.041666668, %v1365_v49  ;;  %v1385_v17 = vmul.f32 0.008333334, %v1365_v49 }
 0x2c1   :  { %v9749_v47 = vadd.f32 %v1378_v42, %v9673_v6  ;;  %v9751_v7 = vadd.f32 %v1386_v61, %v748_v48  ;;  %v1398_v12 = vsel %vm106_vm0, %v1365_v49, 0  ;;  %v1474_v62 = vand.u32 4294901760, %v1473_v59 }
 0x2c2   :  { %v1485_v23 = vsub.f32 %v1483_v27, %v1484_v54  ;;  %v1503_v41 = vsub.f32 %v1401_v36, %v9746_v35  ;;  %v9756_v43 = vadd.f32 %v1377_v53, %v9677_v8  ;;  %v9758_v29 = vadd.f32 %v1385_v17, %v747_v50 }
 0x2c3   :  { %v1492_v52 = vand.u32 4294901760, %v1398_v12  ;;  %v1475_v56 = vsub.f32 %v1473_v59, %v1474_v62 }
 0x2c4   :  { %v1504_v63 = vand.u32 4294901760, %v1503_v41  ;;  %v1486_v6 = vand.u32 4294901760, %v1485_v23 }
 0x2c5   :  { %v1493_v1 = vsub.f32 %v1398_v12, %v1492_v52  ;;  %v1476_v9 = vand.u32 4294901760, %v1475_v56 }
 0x2c6   :  { %v1505_v13 = vsub.f32 %v1503_v41, %v1504_v63 }
 0x2c7   :  { %7830 = vmatprep.mubr.f32.mxu0 %v1476_v9  ;;  %v1494_v10 = vand.u32 4294901760, %v1493_v1 }
 0x2c8   :  { %7831 = vmatmul.mubr.f32.vlgmr.msra.gmra.mrb[4].mxu0 %v1486_v6  ;;  %v1506_v8 = vand.u32 4294901760, %v1505_v13 }
 0x2c9   :  { %8693 = vmatpush3.bf16.msra.mxu0 %v9641_v40  ;;  %v1495_v24 = vsub.f32 %v1493_v1, %v1494_v10 }
 0x2ca   :  { %8695 = vmatprep.subr.bf16.mxu0 %v9669_v4 }
 0x2cb   :  { %v1496_v15 = vand.u32 4294901760, %v1495_v24 }
 0x2cd   :  { %7833 = vmatprep.mubr.f32.mxu0 %v1496_v15  ;;  %8697 = vmatpush3.bf16.msra.mxu0 %v9669_v4 }
 0x2ce   :  { %7834 = vmatmul.mubr.f32.gmra.mrb[6].mxu0 %v1506_v8  ;;  %8699 = vmatprep.subr.bf16.mxu0 %v9639_v31 }
 0x2cf   :  { %7844 = vmatprep.mubr.f32.mxu0 %v9734_v26 }
 0x2d2   :  { %7845 = vmatmul.mubr.f32.vlgmr.msra.gmra.mrb[4].mxu0 %v9726_v16 }
 0x2d3   :  { %8701 = vmatpush3.bf16.msra.mxu0 %v9639_v31  ;;  %7847 = vmatprep.mubr.f32.mxu0 %v1492_v52 }
 0x2d4   :  { %8703 = vmatprep.subr.bf16.mxu0 %v9644_v55 }
 0x2d6   :  { %7848 = vmatmul.mubr.f32.gmra.mrb[6].mxu0 %v9746_v35 }
 0x2d7   :  { %8705 = vmatpush3.bf16.msra.mxu0 %v9644_v55  ;;  %7858 = vmatprep.mubr.f32.mxu0 %v1473_v59 }
 0x2d8   :  { %8707 = vmatprep.subr.bf16.mxu0 %v9598_v45 }
 0x2da   :  { %7859 = vmatmul.mubr.f32.vlgmr.msra.gmra.mrb[4].mxu0 %v1483_v27 }
 0x2db   :  { %8709 = vmatpush3.bf16.msra.mxu0 %v9598_v45  ;;  %7861 = vmatprep.mubr.f32.mxu0 %v1493_v1 }
 0x2dc   :  { %8711 = vmatprep.subr.bf16.mxu0 %v9623_v3 }
 0x2de   :  { %7862 = vmatmul.mubr.f32.gmra.mrb[6].mxu0 %v1503_v41 }
 0x2df   :  { %8713 = vmatpush3.bf16.msra.mxu0 %v9623_v3  ;;  %7872 = vmatprep.mubr.f32.mxu0 %v1474_v62 }
 0x2e0   :  { %8715 = vmatprep.subr.bf16.mxu0 %v9646_v2 }
 0x2e2   :  { %7873 = vmatmul.mubr.f32.vlgmr.msra.gmra.mrb[4].mxu0 %v1484_v54 }
 0x2e3   :  { %8717 = vmatpush3.bf16.msra.mxu0 %v9646_v2  ;;  %7875 = vmatprep.mubr.f32.mxu0 %v1494_v10 }
 0x2e4   :  { %8719 = vmatprep.subr.bf16.mxu0 %v9648_v5 }
 0x2e6   :  { %7876 = vmatmul.mubr.f32.gmra.mrb[6].mxu0 %v1504_v63 }
 0x2e7   :  { %8721 = vmatpush3.bf16.msra.mxu0 %v9648_v5  ;;  %7886 = vmatprep.mubr.f32.mxu0 %v9734_v26 }
 0x2e8   :  { %8723 = vmatprep.subr.bf16.mxu0 %v9598_v45 }
 0x2ea   :  { %7887 = vmatmul.mubr.f32.vlgmr.msra.gmra.mrb[4].mxu0 %v9726_v16 }
 0x2eb   :  { %8725 = vmatpush3.bf16.msra.mxu0 %v9598_v45  ;;  %7889 = vmatprep.mubr.f32.mxu0 %v1492_v52 }
 0x2ec   :  { %8727 = vmatprep.subr.bf16.mxu0 %v9623_v3 }
 0x2ee   :  { %7890 = vmatmul.mubr.f32.gmra.mrb[6].mxu0 %v9746_v35 }
 0x2ef   :  { %8729 = vmatpush3.bf16.msra.mxu0 %v9623_v3  ;;  %7900 = vmatprep.mubr.f32.mxu0 %v9734_v26 }
 0x2f2   :  { %7901 = vmatmul.mubr.f32.vlgmr.msra.gmra.mrb[4].mxu0 %v9726_v16 }
 0x2f3   :  { %7903 = vmatprep.mubr.f32.mxu0 %v1492_v52 }
 0x2f6   :  { %7904 = vmatmul.mubr.f32.gmra.mrb[6].mxu0 %v9746_v35 }
 0x2f7   :  { %7998 = vmatprep.mubr.f32.mxu0 %v9491_v33 }
 0x3c5   :  { %v7902_v18 = vpop.f32.mrb[4].mxu0 }
 0x3c6   :  { %v2018_v48 = vmul.f32 0.0013888889, %v7902_v18  ;;  %v2026_v27 = vmul.f32 0.0001984127, %v7902_v18  ;;  %v2037_v34 = vsel %vm106_vm0, %v7902_v18, 0  ;;  %v1995_v50 = vpop.f32.mrb[5].mxu0 }
 0x3c7   :  { %v9790_v59 = vand.u32 4294901760, %v2037_v34  ;;  %v2017_v42 = vmul.f32 0.0013888889, %v1995_v50  ;;  %v2025_v61 = vmul.f32 0.0001984127, %v1995_v50  ;;  %v2034_v36 = vsel %vm106_vm0, %v1995_v50, 0 }
 0x3c8   :  { %v9794_v26 = vadd.f32 %v2026_v27, %v9732_v22  ;;  %v9796_v16 = vand.u32 4294901760, %v2034_v36  ;;  %v9799_v49 = vadd.f32 %v2018_v48, %v9730_v37 }
 0x3c9   :  { %v2125_v33 = vsub.f32 %v2037_v34, %v9790_v59  ;;  %v9803_v54 = vadd.f32 %v2025_v61, %v9741_v30  ;;  %v7905_v35 = vpop.f32.mrb[6].mxu0  ;;  %v9806_v53 = vadd.f32 %v2017_v42, %v9739_v28 }
 0x3ca   :  { %v2115_v17 = vsub.f32 %v2034_v36, %v9796_v16  ;;  %v2020_v12 = vmul.f32 0.0013888889, %v7905_v35  ;;  %v2028_v62 = vmul.f32 0.0001984127, %v7905_v35  ;;  %v2043_v22 = vsel %vm106_vm0, %v7905_v35, 0  ;;  %v2007_v23 = vpop.f32.mrb[7].mxu0 }
 0x3cb   :  { %v2126_v41 = vand.u32 4294901760, %v2125_v33  ;;  %v9810_v52 = vand.u32 4294901760, %v2043_v22  ;;  %v2019_v37 = vmul.f32 0.0013888889, %v2007_v23  ;;  %v2027_v56 = vmul.f32 0.0001984127, %v2007_v23 }
 0x3cc   :  { %v9813_v63 = vadd.f32 %v2028_v62, %v9751_v7  ;;  %v2040_v30 = vsel %vm106_vm0, %v2007_v23, 0  ;;  %v2116_v1 = vand.u32 4294901760, %v2115_v17  ;;  %v9817_v28 = vadd.f32 %v2020_v12, %v9749_v47 }
 0x3cd   :  { %v2127_v9 = vsub.f32 %v2125_v33, %v2126_v41  ;;  %v2145_v6 = vsub.f32 %v2043_v22, %v9810_v52  ;;  %v9821_v10 = vadd.f32 %v2027_v56, %v9758_v29  ;;  %v2134_v13 = vand.u32 4294901760, %v2040_v30 }
 0x3ce   :  { %v2117_v24 = vsub.f32 %v2115_v17, %v2116_v1  ;;  %v9824_v15 = vadd.f32 %v2019_v37, %v9756_v43 }
 0x3cf   :  { %v2135_v8 = vsub.f32 %v2040_v30, %v2134_v13  ;;  %v2146_v7 = vand.u32 4294901760, %v2145_v6  ;;  %v2128_v48 = vand.u32 4294901760, %v2127_v9 }
 0x3d0   :  { %v2118_v18 = vand.u32 4294901760, %v2117_v24 }
 0x3d1   :  { %v2136_v27 = vand.u32 4294901760, %v2135_v8  ;;  %v2147_v34 = vsub.f32 %v2145_v6, %v2146_v7 }
 0x3d2   :  { %7914 = vmatprep.mubr.f32.mxu1 %v2118_v18 }
 0x3d3   :  { %7915 = vmatmul.mubr.f32.vlgmr.msra.gmra.mrb[8].mxu1 %v2128_v48  ;;  %v2137_v47 = vsub.f32 %v2135_v8, %v2136_v27  ;;  %v2148_v50 = vand.u32 4294901760, %v2147_v34 }
 0x3d4   :  { %8741 = vmatpush3.bf16.msra.mxu1 %v9641_v40 }
 0x3d5   :  { %8743 = vmatprep.subr.bf16.mxu1 %v9669_v4  ;;  %v2138_v29 = vand.u32 4294901760, %v2137_v47 }
 0x3d7   :  { %7917 = vmatprep.mubr.f32.mxu1 %v2138_v29 }
 0x3d8   :  { %7918 = vmatmul.mubr.f32.gmra.mrb[10].mxu1 %v2148_v50 }
 0x3d9   :  { %8745 = vmatpush3.bf16.msra.mxu1 %v9669_v4  ;;  %7928 = vmatprep.mubr.f32.mxu1 %v9796_v16 }
 0x3da   :  { %8747 = vmatprep.subr.bf16.mxu1 %v9639_v31 }
 0x3dc   :  { %7929 = vmatmul.mubr.f32.vlgmr.msra.gmra.mrb[8].mxu1 %v9790_v59 }
 0x3dd   :  { %8749 = vmatpush3.bf16.msra.mxu1 %v9639_v31  ;;  %7931 = vmatprep.mubr.f32.mxu1 %v2134_v13 }
 0x3de   :  { %8751 = vmatprep.subr.bf16.mxu1 %v9644_v55 }
 0x3e0   :  { %7932 = vmatmul.mubr.f32.gmra.mrb[10].mxu1 %v9810_v52 }
 0x3e1   :  { %8753 = vmatpush3.bf16.msra.mxu1 %v9644_v55  ;;  %7942 = vmatprep.mubr.f32.mxu1 %v2115_v17 }
 0x3e2   :  { %8755 = vmatprep.subr.bf16.mxu1 %v9598_v45 }
 0x3e4   :  { %7943 = vmatmul.mubr.f32.vlgmr.msra.gmra.mrb[8].mxu1 %v2125_v33 }
 0x3e5   :  { %8757 = vmatpush3.bf16.msra.mxu1 %v9598_v45  ;;  %7945 = vmatprep.mubr.f32.mxu1 %v2135_v8 }
 0x3e6   :  { %8759 = vmatprep.subr.bf16.mxu1 %v9623_v3 }
 0x3e8   :  { %7946 = vmatmul.mubr.f32.gmra.mrb[10].mxu1 %v2145_v6 }
 0x3e9   :  { %8761 = vmatpush3.bf16.msra.mxu1 %v9623_v3  ;;  %7956 = vmatprep.mubr.f32.mxu1 %v2116_v1 }
 0x3ea   :  { %8763 = vmatprep.subr.bf16.mxu1 %v9646_v2 }
 0x3ec   :  { %7957 = vmatmul.mubr.f32.vlgmr.msra.gmra.mrb[8].mxu1 %v2126_v41 }
 0x3ed   :  { %8765 = vmatpush3.bf16.msra.mxu1 %v9646_v2  ;;  %7959 = vmatprep.mubr.f32.mxu1 %v2136_v27 }
 0x3ee   :  { %8767 = vmatprep.subr.bf16.mxu1 %v9648_v5 }
 0x3f0   :  { %7960 = vmatmul.mubr.f32.gmra.mrb[10].mxu1 %v2146_v7 }
 0x3f1   :  { %8769 = vmatpush3.bf16.msra.mxu1 %v9648_v5  ;;  %7970 = vmatprep.mubr.f32.mxu1 %v9796_v16 }
 0x3f2   :  { %8771 = vmatprep.subr.bf16.mxu1 %v9598_v45 }
 0x3f4   :  { %7971 = vmatmul.mubr.f32.vlgmr.msra.gmra.mrb[8].mxu1 %v9790_v59 }
 0x3f5   :  { %8773 = vmatpush3.bf16.msra.mxu1 %v9598_v45  ;;  %7973 = vmatprep.mubr.f32.mxu1 %v2134_v13 }
 0x3f6   :  { %8775 = vmatprep.subr.bf16.mxu1 %v9623_v3 }
 0x3f8   :  { %7974 = vmatmul.mubr.f32.gmra.mrb[10].mxu1 %v9810_v52 }
 0x3f9   :  { %8777 = vmatpush3.bf16.msra.mxu1 %v9623_v3  ;;  %7984 = vmatprep.mubr.f32.mxu1 %v9796_v16 }
 0x3fc   :  { %7985 = vmatmul.mubr.f32.vlgmr.msra.gmra.mrb[8].mxu1 %v9790_v59 }
 0x3fd   :  { %7987 = vmatprep.mubr.f32.mxu1 %v2134_v13 }
 0x400   :  { %7988 = vmatmul.mubr.f32.gmra.mrb[10].mxu1 %v9810_v52 }
 0x4cf   :  { %v7986_v31 = vpop.f32.mrb[8].mxu1 }
 0x4d0   :  { %v2660_v40 = vmul.f32 2.4801588e-05, %v7986_v31  ;;  %v2668_v55 = vmul.f32 2.7557319e-06, %v7986_v31  ;;  %v2637_v2 = vpop.f32.mrb[9].mxu1 }
 0x4d1   :  { %v2659_v5 = vmul.f32 2.4801588e-05, %v2637_v2  ;;  %v2667_v45 = vmul.f32 2.7557319e-06, %v2637_v2 }
 0x4d2   :  { %v2672_v4 = vadd.f32 %v2668_v55, %v9794_v26  ;;  %v9856_v43 = vadd.f32 %v2660_v40, %v9799_v49 }
 0x4d3   :  { %v2671_v3 = vadd.f32 %v2667_v45, %v9803_v54  ;;  %v7989_v42 = vpop.f32.mrb[10].mxu1  ;;  %v9860_v61 = vadd.f32 %v2659_v5, %v9806_v53 }
 0x4d4   :  { %v2679_v59 = vand.u32 4294901760, %v2672_v4  ;;  %v2662_v36 = vmul.f32 2.4801588e-05, %v7989_v42  ;;  %v2670_v16 = vmul.f32 2.7557319e-06, %v7989_v42  ;;  %v2649_v33 = vpop.f32.mrb[11].mxu1 }
 0x4d5   :  { %v2676_v35 = vand.u32 4294901760, %v2671_v3  ;;  %v2661_v17 = vmul.f32 2.4801588e-05, %v2649_v33  ;;  %v2669_v12 = vmul.f32 2.7557319e-06, %v2649_v33 }
 0x4d6   :  { %v2793_v62 = vsub.f32 %v2672_v4, %v2679_v59  ;;  %v2674_v22 = vadd.f32 %v2670_v16, %v9813_v63  ;;  %v9864_v26 = vadd.f32 %v2662_v36, %v9817_v28 }
 0x4d7   :  { %v9866_v49 = vpack.c.bf16 %v2679_v59, %v2676_v35  ;;  %v2786_v54 = vsub.f32 %v2671_v3, %v2676_v35  ;;  %v2673_v23 = vadd.f32 %v2669_v12, %v9821_v10  ;;  %v9870_v53 = vadd.f32 %v2661_v17, %v9824_v15 }
 0x4d8   :  { %v2685_v41 = vand.u32 4294901760, %v2674_v22  ;;  %v2794_v52 = vand.u32 4294901760, %v2793_v62 }
 0x4d9   :  { %v2682_v37 = vand.u32 4294901760, %v2673_v23  ;;  %8779 = vmatprep.subr.bf16.mxu0 %v9866_v49  ;;  %v2787_v56 = vand.u32 4294901760, %v2786_v54  ;;  %v8794_v30 = vpack.c.bf16 %v2793_v62, %v2786_v54 }
 0x4da   :  { %v2807_v1 = vsub.f32 %v2674_v22, %v2685_v41  ;;  %8781 = vmatpush3.bf16.msra.mxu0 %v9866_v49  ;;  %v2795_v63 = vsub.f32 %v2793_v62, %v2794_v52 }
 0x4db   :  { %v8782_v28 = vpack.c.bf16 %v2685_v41, %v2682_v37  ;;  %v2800_v9 = vsub.f32 %v2673_v23, %v2682_v37  ;;  %v2788_v6 = vsub.f32 %v2786_v54, %v2787_v56  ;;  %v8810_v13 = vpack.c.bf16 %v2794_v52, %v2787_v56 }
 0x4dc   :  { %v2796_v24 = vand.u32 4294901760, %v2795_v63  ;;  %v2808_v10 = vand.u32 4294901760, %v2807_v1 }
 0x4dd   :  { %8783 = vmatprep.subr.bf16.mxu0 %v8782_v28  ;;  %v2789_v15 = vand.u32 4294901760, %v2788_v6  ;;  %v2801_v8 = vand.u32 4294901760, %v2800_v9  ;;  %v8798_v7 = vpack.c.bf16 %v2807_v1, %v2800_v9 }
 0x4de   :  { %8785 = vmatpush3.bf16.msra.mxu0 %v8782_v28  ;;  %v2809_v18 = vsub.f32 %v2807_v1, %v2808_v10 }
 0x4df   :  { %v8786_v48 = vpack.c.bf16 %v2796_v24, %v2789_v15  ;;  %v2802_v27 = vsub.f32 %v2800_v9, %v2801_v8  ;;  %v8814_v34 = vpack.c.bf16 %v2808_v10, %v2801_v8 }
 0x4e0   :  { %v2810_v47 = vand.u32 4294901760, %v2809_v18 }
 0x4e1   :  { %7999 = vmatmul.mubr.f32.vlgmr.msra.gmra.mrb[8].mxu0 %v9521_v58  ;;  %8787 = vmatprep.subr.bf16.mxu0 %v8786_v48  ;;  %v2803_v29 = vand.u32 4294901760, %v2802_v27 }
 0x4e2   :  { %8001 = vmatprep.mubr.f32.mxu0 %v9523_v60  ;;  %8789 = vmatpush3.bf16.msra.mxu0 %v8786_v48 }
 0x4e3   :  { %v8790_v50 = vpack.c.bf16 %v2810_v47, %v2803_v29 }
 0x4e5   :  { %8002 = vmatmul.mubr.f32.gmra.mrb[10].mxu0 %v9530_v0  ;;  %8791 = vmatprep.subr.bf16.mxu0 %v8790_v50 }
 0x4e6   :  { %8793 = vmatpush3.bf16.msra.mxu0 %v8790_v50  ;;  %8012 = vmatprep.mubr.f32.mxu0 %v9460_v11 }
 0x4e7   :  { %8795 = vmatprep.subr.bf16.mxu0 %v8794_v30 }
 0x4e9   :  { %8013 = vmatmul.mubr.f32.vlgmr.msra.gmra.mrb[8].mxu0 %v9468_v19 }
 0x4ea   :  { %8015 = vmatprep.mubr.f32.mxu0 %v9488_v32  ;;  %8797 = vmatpush3.bf16.msra.mxu0 %v8794_v30 }
 0x4eb   :  { %8799 = vmatprep.subr.bf16.mxu0 %v8798_v7 }
 0x4ed   :  { %8016 = vmatmul.mubr.f32.gmra.mrb[10].mxu0 %v9506_v44 }
 0x4ee   :  { %8801 = vmatpush3.bf16.msra.mxu0 %v8798_v7  ;;  %8026 = vmatprep.mubr.f32.mxu0 %v9465_v14 }
 0x4ef   :  { %8803 = vmatprep.subr.bf16.mxu0 %v9866_v49 }
 0x4f1   :  { %8027 = vmatmul.mubr.f32.vlgmr.msra.gmra.mrb[8].mxu0 %v9480_v25 }
 0x4f2   :  { %8029 = vmatprep.mubr.f32.mxu0 %v9501_v39  ;;  %8805 = vmatpush3.bf16.msra.mxu0 %v9866_v49 }
 0x4f3   :  { %8807 = vmatprep.subr.bf16.mxu0 %v8782_v28 }
 0x4f5   :  { %8030 = vmatmul.mubr.f32.gmra.mrb[10].mxu0 %v9514_v51 }
 0x4f6   :  { %8809 = vmatpush3.bf16.msra.mxu0 %v8782_v28  ;;  %8040 = vmatprep.mubr.f32.mxu0 %v9472_v20 }
 0x4f7   :  { %8811 = vmatprep.subr.bf16.mxu0 %v8810_v13 }
 0x4f9   :  { %8041 = vmatmul.mubr.f32.vlgmr.msra.gmra.mrb[8].mxu0 %v9498_v38 }
 0x4fa   :  { %8043 = vmatprep.mubr.f32.mxu0 %v9509_v46  ;;  %8813 = vmatpush3.bf16.msra.mxu0 %v8810_v13 }
 0x4fb   :  { %8815 = vmatprep.subr.bf16.mxu0 %v8814_v34 }
 0x4fd   :  { %8044 = vmatmul.mubr.f32.gmra.mrb[10].mxu0 %v9519_v57 }
 0x4fe   :  { %8817 = vmatpush3.bf16.msra.mxu0 %v8814_v34  ;;  %8054 = vmatprep.mubr.f32.mxu0 %v9460_v11 }
 0x4ff   :  { %8819 = vmatprep.subr.bf16.mxu0 %v9866_v49 }
 0x501   :  { %8055 = vmatmul.mubr.f32.vlgmr.msra.gmra.mrb[8].mxu0 %v9468_v19 }
 0x502   :  { %8057 = vmatprep.mubr.f32.mxu0 %v9488_v32  ;;  %8821 = vmatpush3.bf16.msra.mxu0 %v9866_v49 }
 0x503   :  { %8823 = vmatprep.subr.bf16.mxu0 %v8782_v28 }
 0x505   :  { %8058 = vmatmul.mubr.f32.gmra.mrb[10].mxu0 %v9506_v44 }
 0x506   :  { %8825 = vmatpush3.bf16.msra.mxu0 %v8782_v28  ;;  %8068 = vmatprep.mubr.f32.mxu0 %v9460_v11 }
 0x509   :  { %8069 = vmatmul.mubr.f32.vlgmr.msra.gmra.mrb[8].mxu0 %v9468_v19 }
 0x50a   :  { %8071 = vmatprep.mubr.f32.mxu0 %v9488_v32 }
 0x50d   :  { %8072 = vmatmul.mubr.f32.gmra.mrb[10].mxu0 %v9506_v44 }
 0x5dc   :  { %v8070_v14 = vpop.f32.mrb[8].mxu0 }
 0x5dd   :  { %v3290_v20 = vadd.f32 %v8070_v14, %v9856_v43  ;;  %v3267_v25 = vpop.f32.mrb[9].mxu0 }
 0x5de   :  { %v3289_v38 = vadd.f32 %v3267_v25, %v9860_v61 }
 0x5df   :  { %v3297_v39 = vsel %vm106_vm0, %v3290_v20, 0  ;;  %v3309_v46 = vand.u32 4294901760, %v3290_v20 }
 0x5e0   :  { %v9904_v51 = vand.u32 4294901760, %v3297_v39  ;;  %v3294_v57 = vsel %vm106_vm0, %v3289_v38, 0  ;;  %v3306_v11 = vand.u32 4294901760, %v3289_v38  ;;  %v8073_v58 = vpop.f32.mrb[10].mxu0 }
 0x5e1   :  { %v3423_v19 = vsub.f32 %v3290_v20, %v3309_v46  ;;  %v9907_v60 = vand.u32 4294901760, %v3294_v57  ;;  %v3292_v32 = vadd.f32 %v8073_v58, %v9864_v26  ;;  %v3279_v44 = vpop.f32.mrb[11].mxu0 }
 0x5e2   :  { %v9911_v0 = vsub.f32 %v3297_v39, %v9904_v51  ;;  %v9913_v31 = vpack.c.bf16 %v3309_v46, %v3306_v11  ;;  %v3416_v40 = vsub.f32 %v3289_v38, %v3306_v11  ;;  %v3291_v55 = vadd.f32 %v3279_v44, %v9870_v53 }
 0x5e3   :  { %v9917_v2 = vsub.f32 %v3294_v57, %v9907_v60  ;;  %v3303_v5 = vsel %vm106_vm0, %v3292_v32, 0  ;;  %v3315_v45 = vand.u32 4294901760, %v3292_v32  ;;  %v3424_v4 = vand.u32 4294901760, %v3423_v19 }
 0x5e4   :  { %v3386_v43 = vand.u32 4294901760, %v9911_v0  ;;  %v9921_v3 = vand.u32 4294901760, %v3303_v5  ;;  %v3300_v42 = vsel %vm106_vm0, %v3291_v55, 0  ;;  %v3312_v61 = vand.u32 4294901760, %v3291_v55  ;;  %8827 = vmatprep.subr.bf16.mxu1 %v9913_v31 }
 0x5e5   :  { %v3437_v59 = vsub.f32 %v3292_v32, %v3315_v45  ;;  %v9925_v36 = vand.u32 4294901760, %v3300_v42  ;;  %8829 = vmatpush3.bf16.msra.mxu1 %v9913_v31  ;;  %v3376_v16 = vand.u32 4294901760, %v9917_v2  ;;  %v3417_v33 = vand.u32 4294901760, %v3416_v40 }
 0x5e6   :  { %v3387_v35 = vsub.f32 %v9911_v0, %v3386_v43  ;;  %v3405_v17 = vsub.f32 %v3303_v5, %v9921_v3  ;;  %v9933_v12 = vpack.c.bf16 %v3315_v45, %v3312_v61  ;;  %v3430_v62 = vsub.f32 %v3291_v55, %v3312_v61 }
 0x5e7   :  { %v3395_v22 = vsub.f32 %v3300_v42, %v9925_v36  ;;  %v3377_v26 = vsub.f32 %v9917_v2, %v3376_v16  ;;  %v3418_v49 = vsub.f32 %v3416_v40, %v3417_v33  ;;  %v3425_v54 = vsub.f32 %v3423_v19, %v3424_v4 }
 0x5e8   :  { %v3388_v23 = vand.u32 4294901760, %v3387_v35  ;;  %8831 = vmatprep.subr.bf16.mxu1 %v9933_v12  ;;  %v3406_v53 = vand.u32 4294901760, %v3405_v17  ;;  %v3431_v41 = vand.u32 4294901760, %v3430_v62  ;;  %v3438_v52 = vand.u32 4294901760, %v3437_v59 }
 0x5e9   :  { %8833 = vmatpush3.bf16.msra.mxu1 %v9933_v12  ;;  %v3378_v37 = vand.u32 4294901760, %v3377_v26  ;;  %v3419_v56 = vand.u32 4294901760, %v3418_v49  ;;  %v3426_v30 = vand.u32 4294901760, %v3425_v54  ;;  %v3396_v1 = vand.u32 4294901760, %v3395_v22 }
 0x5ea   :  { %v3407_v63 = vsub.f32 %v3405_v17, %v3406_v53  ;;  %v3432_v28 = vsub.f32 %v3430_v62, %v3431_v41  ;;  %v3439_v9 = vsub.f32 %v3437_v59, %v3438_v52  ;;  %v8842_v6 = vpack.c.bf16 %v3423_v19, %v3416_v40 }
 0x5eb   :  { %8082 = vmatprep.mubr.f32.mxu1 %v3378_v37  ;;  %v8834_v13 = vpack.c.bf16 %v3426_v30, %v3419_v56  ;;  %v3397_v24 = vsub.f32 %v3395_v22, %v3396_v1  ;;  %v8846_v10 = vpack.c.bf16 %v3437_v59, %v3430_v62  ;;  %v8858_v15 = vpack.c.bf16 %v3424_v4, %v3417_v33 }
 0x5ec   :  { %8083 = vmatmul.mubr.f32.vlgmr.msra.gmra.mrb[12].mxu1 %v3388_v23  ;;  %v3433_v8 = vand.u32 4294901760, %v3432_v28  ;;  %v3440_v7 = vand.u32 4294901760, %v3439_v9  ;;  %v8862_v18 = vpack.c.bf16 %v3438_v52, %v3431_v41  ;;  %v3408_v27 = vand.u32 4294901760, %v3407_v63 }
 0x5ed   :  { %8835 = vmatprep.subr.bf16.mxu1 %v8834_v13  ;;  %v3398_v48 = vand.u32 4294901760, %v3397_v24 }
 0x5ee   :  { %8837 = vmatpush3.bf16.msra.mxu1 %v8834_v13  ;;  %v8838_v34 = vpack.c.bf16 %v3440_v7, %v3433_v8 }
 0x5ef   :  { %8085 = vmatprep.mubr.f32.mxu1 %v3398_v48 }
 0x5f0   :  { %8086 = vmatmul.mubr.f32.gmra.mrb[14].mxu1 %v3408_v27  ;;  %8839 = vmatprep.subr.bf16.mxu1 %v8838_v34 }
 0x5f1   :  { %8096 = vmatprep.mubr.f32.mxu1 %v9907_v60 }
 0x5f2   :  { %8841 = vmatpush3.bf16.msra.mxu1 %v8838_v34 }
 0x5f3   :  { %8843 = vmatprep.subr.bf16.mxu1 %v8842_v6 }
 0x5f5   :  { %8097 = vmatmul.mubr.f32.vlgmr.msra.gmra.mrb[12].mxu1 %v9904_v51 }
 0x5f6   :  { %8099 = vmatprep.mubr.f32.mxu1 %v9925_v36  ;;  %8845 = vmatpush3.bf16.msra.mxu1 %v8842_v6 }
 0x5f7   :  { %8847 = vmatprep.subr.bf16.mxu1 %v8846_v10 }
 0x5f9   :  { %8100 = vmatmul.mubr.f32.gmra.mrb[14].mxu1 %v9921_v3 }
 0x5fa   :  { %8849 = vmatpush3.bf16.msra.mxu1 %v8846_v10  ;;  %8110 = vmatprep.mubr.f32.mxu1 %v9917_v2 }
 0x5fb   :  { %8851 = vmatprep.subr.bf16.mxu1 %v9913_v31 }
 0x5fd   :  { %8111 = vmatmul.mubr.f32.vlgmr.msra.gmra.mrb[12].mxu1 %v9911_v0 }
 0x5fe   :  { %8113 = vmatprep.mubr.f32.mxu1 %v3395_v22  ;;  %8853 = vmatpush3.bf16.msra.mxu1 %v9913_v31 }
 0x5ff   :  { %8855 = vmatprep.subr.bf16.mxu1 %v9933_v12 }
 0x601   :  { %8114 = vmatmul.mubr.f32.gmra.mrb[14].mxu1 %v3405_v17 }
 0x602   :  { %8857 = vmatpush3.bf16.msra.mxu1 %v9933_v12  ;;  %8124 = vmatprep.mubr.f32.mxu1 %v3376_v16 }
 0x603   :  { %8859 = vmatprep.subr.bf16.mxu1 %v8858_v15 }
 0x605   :  { %8125 = vmatmul.mubr.f32.vlgmr.msra.gmra.mrb[12].mxu1 %v3386_v43 }
 0x606   :  { %8127 = vmatprep.mubr.f32.mxu1 %v3396_v1  ;;  %8861 = vmatpush3.bf16.msra.mxu1 %v8858_v15 }
 0x607   :  { %8863 = vmatprep.subr.bf16.mxu1 %v8862_v18 }
 0x609   :  { %8128 = vmatmul.mubr.f32.gmra.mrb[14].mxu1 %v3406_v53 }
 0x60a   :  { %8865 = vmatpush3.bf16.msra.mxu1 %v8862_v18  ;;  %8138 = vmatprep.mubr.f32.mxu1 %v9907_v60 }
 0x60b   :  { %8867 = vmatprep.subr.bf16.mxu1 %v9913_v31 }
 0x60d   :  { %8139 = vmatmul.mubr.f32.vlgmr.msra.gmra.mrb[12].mxu1 %v9904_v51 }
 0x60e   :  { %8141 = vmatprep.mubr.f32.mxu1 %v9925_v36  ;;  %8869 = vmatpush3.bf16.msra.mxu1 %v9913_v31 }
 0x60f   :  { %8871 = vmatprep.subr.bf16.mxu1 %v9933_v12 }
 0x611   :  { %8142 = vmatmul.mubr.f32.gmra.mrb[14].mxu1 %v9921_v3 }
 0x612   :  { %8873 = vmatpush3.bf16.msra.mxu1 %v9933_v12  ;;  %8152 = vmatprep.mubr.f32.mxu1 %v9907_v60 }
 0x615   :  { %8153 = vmatmul.mubr.f32.vlgmr.msra.gmra.mrb[12].mxu1 %v9904_v51 }
 0x616   :  { %8155 = vmatprep.mubr.f32.mxu1 %v9925_v36 }
 0x619   :  { %8156 = vmatmul.mubr.f32.gmra.mrb[14].mxu1 %v9921_v3 }
 0x6e8   :  { %v8154_v47 = vpop.f32.mrb[12].mxu1 }
 0x6e9   :  { %v3923_v29 = vsel %vm106_vm0, %v8154_v47, 0  ;;  %v3935_v50 = vand.u32 4294901760, %v8154_v47  ;;  %v3897_v14 = vpop.f32.mrb[13].mxu1 }
 0x6ea   :  { %v9964_v20 = vand.u32 4294901760, %v3923_v29  ;;  %v3920_v25 = vsel %vm106_vm0, %v3897_v14, 0  ;;  %v3932_v38 = vand.u32 4294901760, %v3897_v14 }
 0x6eb   :  { %v4049_v39 = vsub.f32 %v8154_v47, %v3935_v50  ;;  %v9967_v46 = vand.u32 4294901760, %v3920_v25 }
 0x6ec   :  { %v9970_v57 = vsub.f32 %v3923_v29, %v9964_v20  ;;  %v9972_v51 = vpack.c.bf16 %v3935_v50, %v3932_v38  ;;  %v4042_v11 = vsub.f32 %v3897_v14, %v3932_v38  ;;  %v8157_v58 = vpop.f32.mrb[14].mxu1 }
 0x6ed   :  { %v4050_v19 = vand.u32 4294901760, %v4049_v39  ;;  %v9975_v60 = vsub.f32 %v3920_v25, %v9967_v46  ;;  %v3929_v32 = vsel %vm106_vm0, %v8157_v58, 0  ;;  %v3941_v44 = vand.u32 4294901760, %v8157_v58  ;;  %v3909_v0 = vpop.f32.mrb[15].mxu1 }
 0x6ee   :  { %v4012_v31 = vand.u32 4294901760, %v9970_v57  ;;  %v4043_v40 = vand.u32 4294901760, %v4042_v11  ;;  %v9979_v55 = vand.u32 4294901760, %v3929_v32  ;;  %v3926_v2 = vsel %vm106_vm0, %v3909_v0, 0  ;;  %8875 = vmatprep.subr.bf16.mxu0 %v9972_v51 }
 0x6ef   :  { %v4063_v5 = vsub.f32 %v8157_v58, %v3941_v44  ;;  %v3938_v45 = vand.u32 4294901760, %v3909_v0  ;;  %v9983_v4 = vand.u32 4294901760, %v3926_v2  ;;  %8877 = vmatpush3.bf16.msra.mxu0 %v9972_v51  ;;  %v4002_v43 = vand.u32 4294901760, %v9975_v60 }
 0x6f0   :  { %v4013_v3 = vsub.f32 %v9970_v57, %v4012_v31  ;;  %v4031_v42 = vsub.f32 %v3929_v32, %v9979_v55  ;;  %v4044_v61 = vsub.f32 %v4042_v11, %v4043_v40  ;;  %v4051_v59 = vsub.f32 %v4049_v39, %v4050_v19 }
 0x6f1   :  { %v4064_v36 = vand.u32 4294901760, %v4063_v5  ;;  %v9991_v16 = vpack.c.bf16 %v3941_v44, %v3938_v45  ;;  %v4021_v33 = vsub.f32 %v3926_v2, %v9983_v4  ;;  %v4056_v35 = vsub.f32 %v3909_v0, %v3938_v45 }
 0x6f2   :  { %v4014_v17 = vand.u32 4294901760, %v4013_v3  ;;  %v4003_v12 = vsub.f32 %v9975_v60, %v4002_v43  ;;  %v4045_v62 = vand.u32 4294901760, %v4044_v61  ;;  %v4052_v22 = vand.u32 4294901760, %v4051_v59 }
 0x6f3   :  { %v4057_v26 = vand.u32 4294901760, %v4056_v35  ;;  %8879 = vmatprep.subr.bf16.mxu0 %v9991_v16  ;;  %v4022_v49 = vand.u32 4294901760, %v4021_v33  ;;  %v4032_v54 = vand.u32 4294901760, %v4031_v42  ;;  %v4065_v23 = vsub.f32 %v4063_v5, %v4064_v36 }
 0x6f4   :  { %8881 = vmatpush3.bf16.msra.mxu0 %v9991_v16  ;;  %v4004_v53 = vand.u32 4294901760, %v4003_v12  ;;  %v8882_v41 = vpack.c.bf16 %v4052_v22, %v4045_v62  ;;  %v8890_v52 = vpack.c.bf16 %v4049_v39, %v4042_v11  ;;  %v8894_v37 = vpack.c.bf16 %v4063_v5, %v4056_v35 }
 0x6f5   :  { %v4023_v56 = vsub.f32 %v4021_v33, %v4022_v49  ;;  %v4033_v30 = vsub.f32 %v4031_v42, %v4032_v54  ;;  %v4058_v1 = vsub.f32 %v4056_v35, %v4057_v26  ;;  %v4066_v63 = vand.u32 4294901760, %v4065_v23 }
 0x6f6   :  { %8166 = vmatprep.mubr.f32.mxu0 %v4004_v53  ;;  %8883 = vmatprep.subr.bf16.mxu0 %v8882_v41  ;;  %v8906_v28 = vpack.c.bf16 %v4050_v19, %v4043_v40  ;;  %v8910_v9 = vpack.c.bf16 %v4064_v36, %v4057_v26 }
 0x6f7   :  { %8167 = vmatmul.mubr.f32.vlgmr.msra.gmra.mrb[12].mxu0 %v4014_v17  ;;  %v4024_v6 = vand.u32 4294901760, %v4023_v56  ;;  %v4059_v13 = vand.u32 4294901760, %v4058_v1  ;;  %v4034_v24 = vand.u32 4294901760, %v4033_v30 }
 0x6f8   :  { %8885 = vmatpush3.bf16.msra.mxu0 %v8882_v41 }
 0x6f9   :  { %8169 = vmatprep.mubr.f32.mxu0 %v4024_v6  ;;  %v8886_v10 = vpack.c.bf16 %v4066_v63, %v4059_v13 }
 0x6fb   :  { %8170 = vmatmul.mubr.f32.gmra.mrb[14].mxu0 %v4034_v24  ;;  %8887 = vmatprep.subr.bf16.mxu0 %v8886_v10 }
 0x6fc   :  { %8889 = vmatpush3.bf16.msra.mxu0 %v8886_v10  ;;  %8180 = vmatprep.mubr.f32.mxu0 %v9967_v46 }
 0x6fd   :  { %8891 = vmatprep.subr.bf16.mxu0 %v8890_v52 }
 0x6ff   :  { %8181 = vmatmul.mubr.f32.vlgmr.msra.gmra.mrb[12].mxu0 %v9964_v20 }
 0x700   :  { %8183 = vmatprep.mubr.f32.mxu0 %v9983_v4  ;;  %8893 = vmatpush3.bf16.msra.mxu0 %v8890_v52 }
 0x701   :  { %8895 = vmatprep.subr.bf16.mxu0 %v8894_v37 }
 0x703   :  { %8184 = vmatmul.mubr.f32.gmra.mrb[14].mxu0 %v9979_v55 }
 0x704   :  { %8897 = vmatpush3.bf16.msra.mxu0 %v8894_v37  ;;  %8194 = vmatprep.mubr.f32.mxu0 %v9975_v60 }
 0x705   :  { %8899 = vmatprep.subr.bf16.mxu0 %v9972_v51 }
 0x707   :  { %8195 = vmatmul.mubr.f32.vlgmr.msra.gmra.mrb[12].mxu0 %v9970_v57 }
 0x708   :  { %8197 = vmatprep.mubr.f32.mxu0 %v4021_v33  ;;  %8901 = vmatpush3.bf16.msra.mxu0 %v9972_v51 }
 0x709   :  { %8903 = vmatprep.subr.bf16.mxu0 %v9991_v16 }
 0x70b   :  { %8198 = vmatmul.mubr.f32.gmra.mrb[14].mxu0 %v4031_v42 }
 0x70c   :  { %8905 = vmatpush3.bf16.msra.mxu0 %v9991_v16  ;;  %8208 = vmatprep.mubr.f32.mxu0 %v4002_v43 }
 0x70d   :  { %8907 = vmatprep.subr.bf16.mxu0 %v8906_v28 }
 0x70f   :  { %8209 = vmatmul.mubr.f32.vlgmr.msra.gmra.mrb[12].mxu0 %v4012_v31 }
 0x710   :  { %8211 = vmatprep.mubr.f32.mxu0 %v4022_v49  ;;  %8909 = vmatpush3.bf16.msra.mxu0 %v8906_v28 }
 0x711   :  { %8911 = vmatprep.subr.bf16.mxu0 %v8910_v9 }
 0x713   :  { %8212 = vmatmul.mubr.f32.gmra.mrb[14].mxu0 %v4032_v54 }
 0x714   :  { %8913 = vmatpush3.bf16.msra.mxu0 %v8910_v9  ;;  %8222 = vmatprep.mubr.f32.mxu0 %v9967_v46 }
 0x715   :  { %8915 = vmatprep.subr.bf16.mxu0 %v9972_v51 }
 0x717   :  { %8223 = vmatmul.mubr.f32.vlgmr.msra.gmra.mrb[12].mxu0 %v9964_v20 }
 0x718   :  { %8225 = vmatprep.mubr.f32.mxu0 %v9983_v4  ;;  %8917 = vmatpush3.bf16.msra.mxu0 %v9972_v51 }
 0x719   :  { %8919 = vmatprep.subr.bf16.mxu0 %v9991_v16 }
 0x71b   :  { %8226 = vmatmul.mubr.f32.gmra.mrb[14].mxu0 %v9979_v55 }
 0x71c   :  { %8921 = vmatpush3.bf16.msra.mxu0 %v9991_v16  ;;  %8236 = vmatprep.mubr.f32.mxu0 %v9967_v46 }
 0x71f   :  { %8237 = vmatmul.mubr.f32.vlgmr.msra.gmra.mrb[12].mxu0 %v9964_v20 }
 0x720   :  { %8239 = vmatprep.mubr.f32.mxu0 %v9983_v4 }
 0x723   :  { %8240 = vmatmul.mubr.f32.gmra.mrb[14].mxu0 %v9979_v55 }
 0x7f2   :  { %v8238_v15 = vpop.f32.mrb[12].mxu0 }
 0x7f3   :  { %v4549_v8 = vsel %vm106_vm0, %v8238_v15, 0  ;;  %v4561_v7 = vand.u32 4294901760, %v8238_v15  ;;  %v4523_v18 = vpop.f32.mrb[13].mxu0 }
 0x7f4   :  { %v10022_v48 = vand.u32 4294901760, %v4549_v8  ;;  %v4546_v27 = vsel %vm106_vm0, %v4523_v18, 0  ;;  %v4558_v34 = vand.u32 4294901760, %v4523_v18 }
 0x7f5   :  { %v4675_v47 = vsub.f32 %v8238_v15, %v4561_v7  ;;  %v10025_v29 = vand.u32 4294901760, %v4546_v27 }
 0x7f6   :  { %v10028_v50 = vsub.f32 %v4549_v8, %v10022_v48  ;;  %v10030_v14 = vpack.c.bf16 %v4561_v7, %v4558_v34  ;;  %v4668_v20 = vsub.f32 %v4523_v18, %v4558_v34  ;;  %v8241_v25 = vpop.f32.mrb[14].mxu0 }
 0x7f7   :  { %v4676_v38 = vand.u32 4294901760, %v4675_v47  ;;  %v10033_v39 = vsub.f32 %v4546_v27, %v10025_v29  ;;  %v4555_v46 = vsel %vm106_vm0, %v8241_v25, 0  ;;  %v4567_v57 = vand.u32 4294901760, %v8241_v25  ;;  %v4535_v51 = vpop.f32.mrb[15].mxu0 }
 0x7f8   :  { %v4638_v11 = vand.u32 4294901760, %v10028_v50  ;;  %v4669_v58 = vand.u32 4294901760, %v4668_v20  ;;  %v10037_v19 = vand.u32 4294901760, %v4555_v46  ;;  %v4552_v60 = vsel %vm106_vm0, %v4535_v51, 0  ;;  %8923 = vmatprep.subr.bf16.mxu1 %v10030_v14 }
 0x7f9   :  { %v4689_v32 = vsub.f32 %v8241_v25, %v4567_v57  ;;  %v4564_v44 = vand.u32 4294901760, %v4535_v51  ;;  %v10041_v0 = vand.u32 4294901760, %v4552_v60  ;;  %8925 = vmatpush3.bf16.msra.mxu1 %v10030_v14  ;;  %v4628_v31 = vand.u32 4294901760, %v10033_v39 }
 0x7fa   :  { %v4639_v40 = vsub.f32 %v10028_v50, %v4638_v11  ;;  %v4657_v55 = vsub.f32 %v4555_v46, %v10037_v19  ;;  %v4670_v2 = vsub.f32 %v4668_v20, %v4669_v58  ;;  %v4677_v5 = vsub.f32 %v4675_v47, %v4676_v38 }
 0x7fb   :  { %v4690_v45 = vand.u32 4294901760, %v4689_v32  ;;  %v10049_v4 = vpack.c.bf16 %v4567_v57, %v4564_v44  ;;  %v4647_v43 = vsub.f32 %v4552_v60, %v10041_v0  ;;  %v4682_v3 = vsub.f32 %v4535_v51, %v4564_v44 }
 0x7fc   :  { %v4640_v42 = vand.u32 4294901760, %v4639_v40  ;;  %v4629_v61 = vsub.f32 %v10033_v39, %v4628_v31  ;;  %v4671_v59 = vand.u32 4294901760, %v4670_v2  ;;  %v4678_v36 = vand.u32 4294901760, %v4677_v5 }
 0x7fd   :  { %v4683_v16 = vand.u32 4294901760, %v4682_v3  ;;  %8927 = vmatprep.subr.bf16.mxu1 %v10049_v4  ;;  %v4648_v33 = vand.u32 4294901760, %v4647_v43  ;;  %v4658_v35 = vand.u32 4294901760, %v4657_v55  ;;  %v4691_v17 = vsub.f32 %v4689_v32, %v4690_v45 }
 0x7fe   :  { %8929 = vmatpush3.bf16.msra.mxu1 %v10049_v4  ;;  %v4630_v12 = vand.u32 4294901760, %v4629_v61  ;;  %v8930_v62 = vpack.c.bf16 %v4678_v36, %v4671_v59  ;;  %v8938_v22 = vpack.c.bf16 %v4675_v47, %v4668_v20  ;;  %v8942_v26 = vpack.c.bf16 %v4689_v32, %v4682_v3 }
 0x7ff   :  { %v4649_v49 = vsub.f32 %v4647_v43, %v4648_v33  ;;  %v4659_v54 = vsub.f32 %v4657_v55, %v4658_v35  ;;  %v4684_v23 = vsub.f32 %v4682_v3, %v4683_v16  ;;  %v4692_v53 = vand.u32 4294901760, %v4691_v17 }
 0x800   :  { %8250 = vmatprep.mubr.f32.mxu1 %v4630_v12  ;;  %8931 = vmatprep.subr.bf16.mxu1 %v8930_v62  ;;  %v8954_v41 = vpack.c.bf16 %v4676_v38, %v4669_v58  ;;  %v8958_v52 = vpack.c.bf16 %v4690_v45, %v4683_v16 }
 0x801   :  { %8251 = vmatmul.mubr.f32.vlgmr.msra.gmra.mrb[16].mxu1 %v4640_v42  ;;  %v4650_v37 = vand.u32 4294901760, %v4649_v49  ;;  %v4685_v56 = vand.u32 4294901760, %v4684_v23  ;;  %v4660_v30 = vand.u32 4294901760, %v4659_v54 }
 0x802   :  { %8933 = vmatpush3.bf16.msra.mxu1 %v8930_v62 }
 0x803   :  { %8253 = vmatprep.mubr.f32.mxu1 %v4650_v37  ;;  %v8934_v1 = vpack.c.bf16 %v4692_v53, %v4685_v56 }
 0x805   :  { %8254 = vmatmul.mubr.f32.gmra.mrb[18].mxu1 %v4660_v30  ;;  %8935 = vmatprep.subr.bf16.mxu1 %v8934_v1 }
 0x806   :  { %8937 = vmatpush3.bf16.msra.mxu1 %v8934_v1  ;;  %8264 = vmatprep.mubr.f32.mxu1 %v10025_v29 }
 0x807   :  { %8939 = vmatprep.subr.bf16.mxu1 %v8938_v22 }
 0x809   :  { %8265 = vmatmul.mubr.f32.vlgmr.msra.gmra.mrb[16].mxu1 %v10022_v48 }
 0x80a   :  { %8267 = vmatprep.mubr.f32.mxu1 %v10041_v0  ;;  %8941 = vmatpush3.bf16.msra.mxu1 %v8938_v22 }
 0x80b   :  { %8943 = vmatprep.subr.bf16.mxu1 %v8942_v26 }
 0x80d   :  { %8268 = vmatmul.mubr.f32.gmra.mrb[18].mxu1 %v10037_v19 }
 0x80e   :  { %8945 = vmatpush3.bf16.msra.mxu1 %v8942_v26  ;;  %8278 = vmatprep.mubr.f32.mxu1 %v10033_v39 }
 0x80f   :  { %8947 = vmatprep.subr.bf16.mxu1 %v10030_v14 }
 0x811   :  { %8279 = vmatmul.mubr.f32.vlgmr.msra.gmra.mrb[16].mxu1 %v10028_v50 }
 0x812   :  { %8281 = vmatprep.mubr.f32.mxu1 %v4647_v43  ;;  %8949 = vmatpush3.bf16.msra.mxu1 %v10030_v14 }
 0x813   :  { %8951 = vmatprep.subr.bf16.mxu1 %v10049_v4 }
 0x815   :  { %8282 = vmatmul.mubr.f32.gmra.mrb[18].mxu1 %v4657_v55 }
 0x816   :  { %8953 = vmatpush3.bf16.msra.mxu1 %v10049_v4  ;;  %8292 = vmatprep.mubr.f32.mxu1 %v4628_v31 }
 0x817   :  { %8955 = vmatprep.subr.bf16.mxu1 %v8954_v41 }
 0x819   :  { %8293 = vmatmul.mubr.f32.vlgmr.msra.gmra.mrb[16].mxu1 %v4638_v11 }
 0x81a   :  { %8295 = vmatprep.mubr.f32.mxu1 %v4648_v33  ;;  %8957 = vmatpush3.bf16.msra.mxu1 %v8954_v41 }
 0x81b   :  { %8959 = vmatprep.subr.bf16.mxu1 %v8958_v52 }
 0x81d   :  { %8296 = vmatmul.mubr.f32.gmra.mrb[18].mxu1 %v4658_v35 }
 0x81e   :  { %8961 = vmatpush3.bf16.msra.mxu1 %v8958_v52  ;;  %8306 = vmatprep.mubr.f32.mxu1 %v10025_v29 }
 0x81f   :  { %8963 = vmatprep.subr.bf16.mxu1 %v10030_v14 }
 0x821   :  { %8307 = vmatmul.mubr.f32.vlgmr.msra.gmra.mrb[16].mxu1 %v10022_v48 }
 0x822   :  { %8309 = vmatprep.mubr.f32.mxu1 %v10041_v0  ;;  %8965 = vmatpush3.bf16.msra.mxu1 %v10030_v14 }
 0x823   :  { %8967 = vmatprep.subr.bf16.mxu1 %v10049_v4 }
 0x825   :  { %8310 = vmatmul.mubr.f32.gmra.mrb[18].mxu1 %v10037_v19 }
 0x826   :  { %8969 = vmatpush3.bf16.msra.mxu1 %v10049_v4  ;;  %8320 = vmatprep.mubr.f32.mxu1 %v10025_v29 }
 0x829   :  { %8321 = vmatmul.mubr.f32.vlgmr.msra.gmra.mrb[16].mxu1 %v10022_v48 }
 0x82a   :  { %8323 = vmatprep.mubr.f32.mxu1 %v10041_v0 }
 0x82d   :  { %8324 = vmatmul.mubr.f32.gmra.mrb[18].mxu1 %v10037_v19 }
 0x8fc   :  { %v8322_v63 = vpop.f32.mrb[16].mxu1 }
 0x8fd   :  { %v5175_v28 = vsel %vm106_vm0, %v8322_v63, 0  ;;  %v5187_v9 = vand.u32 4294901760, %v8322_v63  ;;  %v5149_v6 = vpop.f32.mrb[17].mxu1 }
 0x8fe   :  { %v10080_v13 = vand.u32 4294901760, %v5175_v28  ;;  %v5172_v24 = vsel %vm106_vm0, %v5149_v6, 0  ;;  %v5184_v10 = vand.u32 4294901760, %v5149_v6 }
 0x8ff   :  { %v5301_v15 = vsub.f32 %v8322_v63, %v5187_v9  ;;  %v10083_v8 = vand.u32 4294901760, %v5172_v24 }
 0x900   :  { %v10086_v7 = vsub.f32 %v5175_v28, %v10080_v13  ;;  %v10088_v18 = vpack.c.bf16 %v5187_v9, %v5184_v10  ;;  %v5294_v48 = vsub.f32 %v5149_v6, %v5184_v10  ;;  %v8325_v27 = vpop.f32.mrb[18].mxu1 }
 0x901   :  { %v5302_v34 = vand.u32 4294901760, %v5301_v15  ;;  %v10091_v47 = vsub.f32 %v5172_v24, %v10083_v8  ;;  %v5181_v29 = vsel %vm106_vm0, %v8325_v27, 0  ;;  %v5193_v50 = vand.u32 4294901760, %v8325_v27  ;;  %v5161_v14 = vpop.f32.mrb[19].mxu1 }
 0x902   :  { %v5264_v20 = vand.u32 4294901760, %v10086_v7  ;;  %v5295_v25 = vand.u32 4294901760, %v5294_v48  ;;  %v10095_v38 = vand.u32 4294901760, %v5181_v29  ;;  %v5178_v39 = vsel %vm106_vm0, %v5161_v14, 0  ;;  %8971 = vmatprep.subr.bf16.mxu0 %v10088_v18 }
 0x903   :  { %v5315_v46 = vsub.f32 %v8325_v27, %v5193_v50  ;;  %v5190_v57 = vand.u32 4294901760, %v5161_v14  ;;  %v10099_v51 = vand.u32 4294901760, %v5178_v39  ;;  %8973 = vmatpush3.bf16.msra.mxu0 %v10088_v18  ;;  %v5254_v11 = vand.u32 4294901760, %v10091_v47 }
 0x904   :  { %v5265_v58 = vsub.f32 %v10086_v7, %v5264_v20  ;;  %v5283_v19 = vsub.f32 %v5181_v29, %v10095_v38  ;;  %v5296_v60 = vsub.f32 %v5294_v48, %v5295_v25  ;;  %v5303_v32 = vsub.f32 %v5301_v15, %v5302_v34 }
 0x905   :  { %v5316_v44 = vand.u32 4294901760, %v5315_v46  ;;  %v10107_v0 = vpack.c.bf16 %v5193_v50, %v5190_v57  ;;  %v5273_v31 = vsub.f32 %v5178_v39, %v10099_v51  ;;  %v5308_v40 = vsub.f32 %v5161_v14, %v5190_v57 }
 0x906   :  { %v5266_v55 = vand.u32 4294901760, %v5265_v58  ;;  %v5255_v2 = vsub.f32 %v10091_v47, %v5254_v11  ;;  %v5297_v5 = vand.u32 4294901760, %v5296_v60  ;;  %v5304_v45 = vand.u32 4294901760, %v5303_v32 }
 0x907   :  { %v5309_v4 = vand.u32 4294901760, %v5308_v40  ;;  %8975 = vmatprep.subr.bf16.mxu0 %v10107_v0  ;;  %v5274_v43 = vand.u32 4294901760, %v5273_v31  ;;  %v5284_v3 = vand.u32 4294901760, %v5283_v19  ;;  %v5317_v42 = vsub.f32 %v5315_v46, %v5316_v44 }
 0x908   :  { %8977 = vmatpush3.bf16.msra.mxu0 %v10107_v0  ;;  %v5256_v61 = vand.u32 4294901760, %v5255_v2  ;;  %v8978_v59 = vpack.c.bf16 %v5304_v45, %v5297_v5  ;;  %v8986_v36 = vpack.c.bf16 %v5301_v15, %v5294_v48  ;;  %v8990_v16 = vpack.c.bf16 %v5315_v46, %v5308_v40 }
 0x909   :  { %v5275_v33 = vsub.f32 %v5273_v31, %v5274_v43  ;;  %v5285_v35 = vsub.f32 %v5283_v19, %v5284_v3  ;;  %v5310_v17 = vsub.f32 %v5308_v40, %v5309_v4  ;;  %v5318_v12 = vand.u32 4294901760, %v5317_v42 }
 0x90a   :  { %8334 = vmatprep.mubr.f32.mxu0 %v5256_v61  ;;  %8979 = vmatprep.subr.bf16.mxu0 %v8978_v59  ;;  %v9002_v62 = vpack.c.bf16 %v5302_v34, %v5295_v25  ;;  %v9006_v22 = vpack.c.bf16 %v5316_v44, %v5309_v4 }
 0x90b   :  { %8335 = vmatmul.mubr.f32.vlgmr.msra.gmra.mrb[16].mxu0 %v5266_v55  ;;  %v5276_v26 = vand.u32 4294901760, %v5275_v33  ;;  %v5311_v49 = vand.u32 4294901760, %v5310_v17  ;;  %v5286_v54 = vand.u32 4294901760, %v5285_v35 }
 0x90c   :  { %8981 = vmatpush3.bf16.msra.mxu0 %v8978_v59 }
 0x90d   :  { %8337 = vmatprep.mubr.f32.mxu0 %v5276_v26  ;;  %v8982_v23 = vpack.c.bf16 %v5318_v12, %v5311_v49 }
 0x90f   :  { %8338 = vmatmul.mubr.f32.gmra.mrb[18].mxu0 %v5286_v54  ;;  %8983 = vmatprep.subr.bf16.mxu0 %v8982_v23 }
 0x910   :  { %8985 = vmatpush3.bf16.msra.mxu0 %v8982_v23  ;;  %8348 = vmatprep.mubr.f32.mxu0 %v10083_v8 }
 0x911   :  { %8987 = vmatprep.subr.bf16.mxu0 %v8986_v36 }
 0x913   :  { %8349 = vmatmul.mubr.f32.vlgmr.msra.gmra.mrb[16].mxu0 %v10080_v13 }
 0x914   :  { %8351 = vmatprep.mubr.f32.mxu0 %v10099_v51  ;;  %8989 = vmatpush3.bf16.msra.mxu0 %v8986_v36 }
 0x915   :  { %8991 = vmatprep.subr.bf16.mxu0 %v8990_v16 }
 0x917   :  { %8352 = vmatmul.mubr.f32.gmra.mrb[18].mxu0 %v10095_v38 }
 0x918   :  { %8993 = vmatpush3.bf16.msra.mxu0 %v8990_v16  ;;  %8362 = vmatprep.mubr.f32.mxu0 %v10091_v47 }
 0x919   :  { %8995 = vmatprep.subr.bf16.mxu0 %v10088_v18 }
 0x91b   :  { %8363 = vmatmul.mubr.f32.vlgmr.msra.gmra.mrb[16].mxu0 %v10086_v7 }
 0x91c   :  { %8365 = vmatprep.mubr.f32.mxu0 %v5273_v31  ;;  %8997 = vmatpush3.bf16.msra.mxu0 %v10088_v18 }
 0x91d   :  { %8999 = vmatprep.subr.bf16.mxu0 %v10107_v0 }
 0x91f   :  { %8366 = vmatmul.mubr.f32.gmra.mrb[18].mxu0 %v5283_v19 }
 0x920   :  { %9001 = vmatpush3.bf16.msra.mxu0 %v10107_v0  ;;  %8376 = vmatprep.mubr.f32.mxu0 %v5254_v11 }
 0x921   :  { %9003 = vmatprep.subr.bf16.mxu0 %v9002_v62 }
 0x923   :  { %8377 = vmatmul.mubr.f32.vlgmr.msra.gmra.mrb[16].mxu0 %v5264_v20 }
 0x924   :  { %8379 = vmatprep.mubr.f32.mxu0 %v5274_v43  ;;  %9005 = vmatpush3.bf16.msra.mxu0 %v9002_v62 }
 0x925   :  { %9007 = vmatprep.subr.bf16.mxu0 %v9006_v22 }
 0x927   :  { %8380 = vmatmul.mubr.f32.gmra.mrb[18].mxu0 %v5284_v3 }
 0x928   :  { %9009 = vmatpush3.bf16.msra.mxu0 %v9006_v22  ;;  %8390 = vmatprep.mubr.f32.mxu0 %v10083_v8 }
 0x929   :  { %9011 = vmatprep.subr.bf16.mxu0 %v10088_v18 }
 0x92b   :  { %8391 = vmatmul.mubr.f32.vlgmr.msra.gmra.mrb[16].mxu0 %v10080_v13 }
 0x92c   :  { %8393 = vmatprep.mubr.f32.mxu0 %v10099_v51  ;;  %9013 = vmatpush3.bf16.msra.mxu0 %v10088_v18 }
 0x92d   :  { %9015 = vmatprep.subr.bf16.mxu0 %v10107_v0 }
 0x92f   :  { %8394 = vmatmul.mubr.f32.gmra.mrb[18].mxu0 %v10095_v38 }
 0x930   :  { %9017 = vmatpush3.bf16.msra.mxu0 %v10107_v0  ;;  %8404 = vmatprep.mubr.f32.mxu0 %v10083_v8 }
 0x933   :  { %8405 = vmatmul.mubr.f32.vlgmr.msra.gmra.mrb[16].mxu0 %v10080_v13 }
 0x934   :  { %8407 = vmatprep.mubr.f32.mxu0 %v10099_v51 }
 0x937   :  { %8408 = vmatmul.mubr.f32.gmra.mrb[18].mxu0 %v10095_v38 }
 0xa06   :  { %v8406_v53 = vpop.f32.mrb[16].mxu0 }
 0xa07   :  { %v5801_v41 = vsel %vm106_vm0, %v8406_v53, 0  ;;  %v5813_v52 = vand.u32 4294901760, %v8406_v53  ;;  %v5775_v37 = vpop.f32.mrb[17].mxu0 }
 0xa08   :  { %v10138_v56 = vand.u32 4294901760, %v5801_v41  ;;  %v5798_v30 = vsel %vm106_vm0, %v5775_v37, 0  ;;  %v5810_v1 = vand.u32 4294901760, %v5775_v37 }
 0xa09   :  { %v5927_v63 = vsub.f32 %v8406_v53, %v5813_v52  ;;  %v10141_v28 = vand.u32 4294901760, %v5798_v30 }
 0xa0a   :  { %v10144_v9 = vsub.f32 %v5801_v41, %v10138_v56  ;;  %v10146_v6 = vpack.c.bf16 %v5813_v52, %v5810_v1  ;;  %v5920_v13 = vsub.f32 %v5775_v37, %v5810_v1  ;;  %v8409_v24 = vpop.f32.mrb[18].mxu0 }
 0xa0b   :  { %v5928_v10 = vand.u32 4294901760, %v5927_v63  ;;  %v10149_v15 = vsub.f32 %v5798_v30, %v10141_v28  ;;  %v5807_v8 = vsel %vm106_vm0, %v8409_v24, 0  ;;  %v5819_v7 = vand.u32 4294901760, %v8409_v24  ;;  %v5787_v18 = vpop.f32.mrb[19].mxu0 }
 0xa0c   :  { %v5890_v48 = vand.u32 4294901760, %v10144_v9  ;;  %v5921_v27 = vand.u32 4294901760, %v5920_v13  ;;  %v10153_v34 = vand.u32 4294901760, %v5807_v8  ;;  %v5804_v47 = vsel %vm106_vm0, %v5787_v18, 0  ;;  %9019 = vmatprep.subr.bf16.mxu1 %v10146_v6 }
 0xa0d   :  { %v5941_v29 = vsub.f32 %v8409_v24, %v5819_v7  ;;  %v5816_v50 = vand.u32 4294901760, %v5787_v18  ;;  %v10157_v14 = vand.u32 4294901760, %v5804_v47  ;;  %9021 = vmatpush3.bf16.msra.mxu1 %v10146_v6  ;;  %v5880_v20 = vand.u32 4294901760, %v10149_v15 }
 0xa0e   :  { %v5891_v25 = vsub.f32 %v10144_v9, %v5890_v48  ;;  %v5909_v38 = vsub.f32 %v5807_v8, %v10153_v34  ;;  %v5922_v39 = vsub.f32 %v5920_v13, %v5921_v27  ;;  %v5929_v46 = vsub.f32 %v5927_v63, %v5928_v10 }
 0xa0f   :  { %v5942_v57 = vand.u32 4294901760, %v5941_v29  ;;  %v10165_v51 = vpack.c.bf16 %v5819_v7, %v5816_v50  ;;  %v5899_v11 = vsub.f32 %v5804_v47, %v10157_v14  ;;  %v5934_v58 = vsub.f32 %v5787_v18, %v5816_v50 }
 0xa10   :  { %v5892_v19 = vand.u32 4294901760, %v5891_v25  ;;  %v5881_v60 = vsub.f32 %v10149_v15, %v5880_v20  ;;  %v5923_v32 = vand.u32 4294901760, %v5922_v39  ;;  %v5930_v44 = vand.u32 4294901760, %v5929_v46 }
 0xa11   :  { %v5935_v0 = vand.u32 4294901760, %v5934_v58  ;;  %9023 = vmatprep.subr.bf16.mxu1 %v10165_v51  ;;  %v5900_v31 = vand.u32 4294901760, %v5899_v11  ;;  %v5910_v40 = vand.u32 4294901760, %v5909_v38  ;;  %v5943_v55 = vsub.f32 %v5941_v29, %v5942_v57 }
 0xa12   :  { %9025 = vmatpush3.bf16.msra.mxu1 %v10165_v51  ;;  %v5882_v2 = vand.u32 4294901760, %v5881_v60  ;;  %v9026_v5 = vpack.c.bf16 %v5930_v44, %v5923_v32  ;;  %v9034_v45 = vpack.c.bf16 %v5927_v63, %v5920_v13  ;;  %v9038_v4 = vpack.c.bf16 %v5941_v29, %v5934_v58 }
 0xa13   :  { %v5901_v43 = vsub.f32 %v5899_v11, %v5900_v31  ;;  %v5911_v3 = vsub.f32 %v5909_v38, %v5910_v40  ;;  %v5936_v42 = vsub.f32 %v5934_v58, %v5935_v0  ;;  %v5944_v61 = vand.u32 4294901760, %v5943_v55 }
 0xa14   :  { %8418 = vmatprep.mubr.f32.mxu1 %v5882_v2  ;;  %9027 = vmatprep.subr.bf16.mxu1 %v9026_v5  ;;  %v9050_v59 = vpack.c.bf16 %v5928_v10, %v5921_v27  ;;  %v9054_v36 = vpack.c.bf16 %v5942_v57, %v5935_v0 }
 0xa15   :  { %8419 = vmatmul.mubr.f32.vlgmr.msra.gmra.mrb[20].mxu1 %v5892_v19  ;;  %v5902_v16 = vand.u32 4294901760, %v5901_v43  ;;  %v5937_v33 = vand.u32 4294901760, %v5936_v42  ;;  %v5912_v35 = vand.u32 4294901760, %v5911_v3 }
 0xa16   :  { %9029 = vmatpush3.bf16.msra.mxu1 %v9026_v5 }
 0xa17   :  { %8421 = vmatprep.mubr.f32.mxu1 %v5902_v16  ;;  %v9030_v17 = vpack.c.bf16 %v5944_v61, %v5937_v33 }
 0xa19   :  { %8422 = vmatmul.mubr.f32.gmra.mrb[22].mxu1 %v5912_v35  ;;  %9031 = vmatprep.subr.bf16.mxu1 %v9030_v17 }
 0xa1a   :  { %9033 = vmatpush3.bf16.msra.mxu1 %v9030_v17  ;;  %8432 = vmatprep.mubr.f32.mxu1 %v10141_v28 }
 0xa1b   :  { %9035 = vmatprep.subr.bf16.mxu1 %v9034_v45 }
 0xa1d   :  { %8433 = vmatmul.mubr.f32.vlgmr.msra.gmra.mrb[20].mxu1 %v10138_v56 }
 0xa1e   :  { %8435 = vmatprep.mubr.f32.mxu1 %v10157_v14  ;;  %9037 = vmatpush3.bf16.msra.mxu1 %v9034_v45 }
 0xa1f   :  { %9039 = vmatprep.subr.bf16.mxu1 %v9038_v4 }
 0xa21   :  { %8436 = vmatmul.mubr.f32.gmra.mrb[22].mxu1 %v10153_v34 }
 0xa22   :  { %9041 = vmatpush3.bf16.msra.mxu1 %v9038_v4  ;;  %8446 = vmatprep.mubr.f32.mxu1 %v10149_v15 }
 0xa23   :  { %9043 = vmatprep.subr.bf16.mxu1 %v10146_v6 }
 0xa25   :  { %8447 = vmatmul.mubr.f32.vlgmr.msra.gmra.mrb[20].mxu1 %v10144_v9 }
 0xa26   :  { %8449 = vmatprep.mubr.f32.mxu1 %v5899_v11  ;;  %9045 = vmatpush3.bf16.msra.mxu1 %v10146_v6 }
 0xa27   :  { %9047 = vmatprep.subr.bf16.mxu1 %v10165_v51 }
 0xa29   :  { %8450 = vmatmul.mubr.f32.gmra.mrb[22].mxu1 %v5909_v38 }
 0xa2a   :  { %9049 = vmatpush3.bf16.msra.mxu1 %v10165_v51  ;;  %8460 = vmatprep.mubr.f32.mxu1 %v5880_v20 }
 0xa2b   :  { %9051 = vmatprep.subr.bf16.mxu1 %v9050_v59 }
 0xa2d   :  { %8461 = vmatmul.mubr.f32.vlgmr.msra.gmra.mrb[20].mxu1 %v5890_v48 }
 0xa2e   :  { %8463 = vmatprep.mubr.f32.mxu1 %v5900_v31  ;;  %9053 = vmatpush3.bf16.msra.mxu1 %v9050_v59 }
 0xa2f   :  { %9055 = vmatprep.subr.bf16.mxu1 %v9054_v36 }
 0xa31   :  { %8464 = vmatmul.mubr.f32.gmra.mrb[22].mxu1 %v5910_v40 }
 0xa32   :  { %9057 = vmatpush3.bf16.msra.mxu1 %v9054_v36  ;;  %8474 = vmatprep.mubr.f32.mxu1 %v10141_v28 }
 0xa33   :  { %9059 = vmatprep.subr.bf16.mxu1 %v10146_v6 }
 0xa35   :  { %8475 = vmatmul.mubr.f32.vlgmr.msra.gmra.mrb[20].mxu1 %v10138_v56 }
 0xa36   :  { %8477 = vmatprep.mubr.f32.mxu1 %v10157_v14  ;;  %9061 = vmatpush3.bf16.msra.mxu1 %v10146_v6 }
 0xa37   :  { %9063 = vmatprep.subr.bf16.mxu1 %v10165_v51 }
 0xa39   :  { %8478 = vmatmul.mubr.f32.gmra.mrb[22].mxu1 %v10153_v34 }
 0xa3a   :  { %9065 = vmatpush3.bf16.msra.mxu1 %v10165_v51  ;;  %8488 = vmatprep.mubr.f32.mxu1 %v10141_v28 }
 0xa3b   :  { %8578 = vmatprep.subr.bf16.mxu1 %v9417_v21 }
 0xa3d   :  { %8489 = vmatmul.mubr.f32.vlgmr.msra.gmra.mrb[20].mxu1 %v10138_v56 }
 0xa3e   :  { %8491 = vmatprep.mubr.f32.mxu1 %v10157_v14 }
 0xa41   :  { %8492 = vmatmul.mubr.f32.gmra.mrb[22].mxu1 %v10153_v34 }
 0xa42   :  { %8582 = vmatprep.mubr.msk.bf16.mxu1 %vm9418_vm5, %v9417_v21 }
 0xb10   :  { %v8490_v12 = vpop.f32.mrb[20].mxu1 }
 0xb11   :  { %v6427_v62 = vsel %vm106_vm0, %v8490_v12, 0  ;;  %v6439_v22 = vand.u32 4294901760, %v8490_v12  ;;  %v6401_v26 = vpop.f32.mrb[21].mxu1 }
 0xb12   :  { %v10197_v49 = vand.u32 4294901760, %v6427_v62  ;;  %v6424_v54 = vsel %vm106_vm0, %v6401_v26, 0  ;;  %v6436_v23 = vand.u32 4294901760, %v6401_v26 }
 0xb13   :  { %v6553_v53 = vsub.f32 %v8490_v12, %v6439_v22  ;;  %v10200_v41 = vand.u32 4294901760, %v6424_v54  ;;  %v7053_v12 = vld [vmem:[#allocation6] sm:$0xff] }
 0xb14   :  { %v10203_v52 = vsub.f32 %v6427_v62, %v10197_v49  ;;  %v10205_v37 = vpack.c.bf16 %v6439_v22, %v6436_v23  ;;  %v6546_v56 = vsub.f32 %v6401_v26, %v6436_v23  ;;  %v8493_v30 = vpop.f32.mrb[22].mxu1  ;;  %v7054_v22 = vpack.c.bf16 %v7053_v12, %v7053_v12 }
 0xb15   :  { %v6554_v1 = vand.u32 4294901760, %v6553_v53  ;;  %v10208_v63 = vsub.f32 %v6424_v54, %v10200_v41  ;;  %v6433_v28 = vsel %vm106_vm0, %v8493_v30, 0  ;;  %v6445_v9 = vand.u32 4294901760, %v8493_v30  ;;  %v6413_v6 = vpop.f32.mrb[23].mxu1 }
 0xb16   :  { %v6516_v13 = vand.u32 4294901760, %v10203_v52  ;;  %v6547_v24 = vand.u32 4294901760, %v6546_v56  ;;  %v10212_v10 = vand.u32 4294901760, %v6433_v28  ;;  %v6430_v15 = vsel %vm106_vm0, %v6413_v6, 0  ;;  %9067 = vmatprep.subr.bf16.mxu0 %v10205_v37 }
 0xb17   :  { %v6567_v8 = vsub.f32 %v8493_v30, %v6445_v9  ;;  %v6442_v7 = vand.u32 4294901760, %v6413_v6  ;;  %v10216_v18 = vand.u32 4294901760, %v6430_v15  ;;  %9069 = vmatpush3.bf16.msra.mxu0 %v10205_v37  ;;  %v6506_v48 = vand.u32 4294901760, %v10208_v63 }
 0xb18   :  { %v6517_v27 = vsub.f32 %v10203_v52, %v6516_v13  ;;  %v6535_v34 = vsub.f32 %v6433_v28, %v10212_v10  ;;  %v6548_v47 = vsub.f32 %v6546_v56, %v6547_v24  ;;  %v6555_v29 = vsub.f32 %v6553_v53, %v6554_v1 }
 0xb19   :  { %v6568_v50 = vand.u32 4294901760, %v6567_v8  ;;  %v10224_v14 = vpack.c.bf16 %v6445_v9, %v6442_v7  ;;  %v6525_v20 = vsub.f32 %v6430_v15, %v10216_v18  ;;  %v6560_v25 = vsub.f32 %v6413_v6, %v6442_v7 }
 0xb1a   :  { %v6518_v38 = vand.u32 4294901760, %v6517_v27  ;;  %v6507_v39 = vsub.f32 %v10208_v63, %v6506_v48  ;;  %v6549_v46 = vand.u32 4294901760, %v6548_v47  ;;  %v6556_v57 = vand.u32 4294901760, %v6555_v29 }
 0xb1b   :  { %v6561_v51 = vand.u32 4294901760, %v6560_v25  ;;  %9071 = vmatprep.subr.bf16.mxu0 %v10224_v14  ;;  %v6526_v11 = vand.u32 4294901760, %v6525_v20  ;;  %v6536_v58 = vand.u32 4294901760, %v6535_v34  ;;  %v6569_v19 = vsub.f32 %v6567_v8, %v6568_v50 }
 0xb1c   :  { %9073 = vmatpush3.bf16.msra.mxu0 %v10224_v14  ;;  %v6508_v60 = vand.u32 4294901760, %v6507_v39  ;;  %v9074_v32 = vpack.c.bf16 %v6556_v57, %v6549_v46  ;;  %v9082_v44 = vpack.c.bf16 %v6553_v53, %v6546_v56  ;;  %v9086_v0 = vpack.c.bf16 %v6567_v8, %v6560_v25 }
 0xb1d   :  { %v6527_v31 = vsub.f32 %v6525_v20, %v6526_v11  ;;  %v6537_v40 = vsub.f32 %v6535_v34, %v6536_v58  ;;  %v6562_v55 = vsub.f32 %v6560_v25, %v6561_v51  ;;  %v6570_v2 = vand.u32 4294901760, %v6569_v19 }
 0xb1e   :  { %8502 = vmatprep.mubr.f32.mxu0 %v6508_v60  ;;  %9075 = vmatprep.subr.bf16.mxu0 %v9074_v32  ;;  %v9098_v5 = vpack.c.bf16 %v6554_v1, %v6547_v24  ;;  %v9102_v45 = vpack.c.bf16 %v6568_v50, %v6561_v51 }
 0xb1f   :  { %8503 = vmatmul.mubr.f32.vlgmr.msra.gmra.mrb[20].mxu0 %v6518_v38  ;;  %v6528_v4 = vand.u32 4294901760, %v6527_v31  ;;  %v6563_v43 = vand.u32 4294901760, %v6562_v55  ;;  %v6538_v3 = vand.u32 4294901760, %v6537_v40 }
 0xb20   :  { %9077 = vmatpush3.bf16.msra.mxu0 %v9074_v32 }
 0xb21   :  { %8505 = vmatprep.mubr.f32.mxu0 %v6528_v4  ;;  %v9078_v42 = vpack.c.bf16 %v6570_v2, %v6563_v43 }
 0xb23   :  { %8506 = vmatmul.mubr.f32.gmra.mrb[22].mxu0 %v6538_v3  ;;  %9079 = vmatprep.subr.bf16.mxu0 %v9078_v42 }
 0xb24   :  { %9081 = vmatpush3.bf16.msra.mxu0 %v9078_v42  ;;  %8516 = vmatprep.mubr.f32.mxu0 %v10200_v41 }
 0xb25   :  { %9083 = vmatprep.subr.bf16.mxu0 %v9082_v44 }
 0xb27   :  { %8517 = vmatmul.mubr.f32.vlgmr.msra.gmra.mrb[20].mxu0 %v10197_v49 }
 0xb28   :  { %8519 = vmatprep.mubr.f32.mxu0 %v10216_v18  ;;  %9085 = vmatpush3.bf16.msra.mxu0 %v9082_v44 }
 0xb29   :  { %9087 = vmatprep.subr.bf16.mxu0 %v9086_v0 }
 0xb2b   :  { %8520 = vmatmul.mubr.f32.gmra.mrb[22].mxu0 %v10212_v10 }
 0xb2c   :  { %9089 = vmatpush3.bf16.msra.mxu0 %v9086_v0  ;;  %8530 = vmatprep.mubr.f32.mxu0 %v10208_v63 }
 0xb2d   :  { %9091 = vmatprep.subr.bf16.mxu0 %v10205_v37 }
 0xb2f   :  { %8531 = vmatmul.mubr.f32.vlgmr.msra.gmra.mrb[20].mxu0 %v10203_v52 }
 0xb30   :  { %8533 = vmatprep.mubr.f32.mxu0 %v6525_v20  ;;  %9093 = vmatpush3.bf16.msra.mxu0 %v10205_v37 }
 0xb31   :  { %9095 = vmatprep.subr.bf16.mxu0 %v10224_v14 }
 0xb33   :  { %8534 = vmatmul.mubr.f32.gmra.mrb[22].mxu0 %v6535_v34 }
 0xb34   :  { %9097 = vmatpush3.bf16.msra.mxu0 %v10224_v14  ;;  %8544 = vmatprep.mubr.f32.mxu0 %v6506_v48 }
 0xb35   :  { %9099 = vmatprep.subr.bf16.mxu0 %v9098_v5 }
 0xb37   :  { %8545 = vmatmul.mubr.f32.vlgmr.msra.gmra.mrb[20].mxu0 %v6516_v13 }
 0xb38   :  { %8547 = vmatprep.mubr.f32.mxu0 %v6526_v11  ;;  %9101 = vmatpush3.bf16.msra.mxu0 %v9098_v5 }
 0xb39   :  { %9103 = vmatprep.subr.bf16.mxu0 %v9102_v45 }
 0xb3b   :  { %8548 = vmatmul.mubr.f32.gmra.mrb[22].mxu0 %v6536_v58 }
 0xb3c   :  { %9105 = vmatpush3.bf16.msra.mxu0 %v9102_v45  ;;  %8558 = vmatprep.mubr.f32.mxu0 %v10200_v41 }
 0xb3d   :  { %9107 = vmatprep.subr.bf16.mxu0 %v10205_v37 }
 0xb3f   :  { %8559 = vmatmul.mubr.f32.vlgmr.msra.gmra.mrb[20].mxu0 %v10197_v49 }
 0xb40   :  { %8561 = vmatprep.mubr.f32.mxu0 %v10216_v18  ;;  %9109 = vmatpush3.bf16.msra.mxu0 %v10205_v37 }
 0xb41   :  { %9111 = vmatprep.subr.bf16.mxu0 %v10224_v14 }
 0xb43   :  { %8562 = vmatmul.mubr.f32.gmra.mrb[22].mxu0 %v10212_v10 }
 0xb44   :  { %9113 = vmatpush3.bf16.msra.mxu0 %v10224_v14  ;;  %8572 = vmatprep.mubr.f32.mxu0 %v10200_v41 }
 0xb47   :  { %8573 = vmatmul.mubr.f32.vlgmr.msra.gmra.mrb[20].mxu0 %v10197_v49 }
 0xb48   :  { %8575 = vmatprep.mubr.f32.mxu0 %v10216_v18 }
 0xb4b   :  { %8576 = vmatmul.mubr.f32.gmra.mrb[22].mxu0 %v10212_v10 }
 0xc1a   :  { %v8574_v61 = vpop.f32.mrb[20].mxu0 }
 0xc1b   :  { %v7027_v59 = vpop.f32.mrb[21].mxu0 }
 0xc1c   :  { %v7049_v36 = vpack.c.bf16 %v8574_v61, %v7027_v59 }
 0xc1e   :  { %7051 = vst.msk [vmem:[#allocation2] sm:$0xff] %vm106_vm0, %v7049_v36  ;;  %v8577_v16 = vpop.f32.mrb[22].mxu0 }
 0xc1f   :  { %v7039_v33 = vpop.f32.mrb[23].mxu0 }
 0xc20   :  { %v7050_v35 = vpack.c.bf16 %v8577_v16, %v7039_v33 }
 0xc22   :  { %7052 = vst.msk [vmem:[#allocation2 + $0x8] sm:$0xff] %vm106_vm0, %v7050_v35 }
 0xc25   :  { %v7055_v17 = vld [vmem:[#allocation2] sm:$0xff] }
 0xc26   :  { %8579 = vmatpush3.bf16.msra.mxu1 %v7055_v17 }
 0xc27   :  { %8580 = vmatprep.subr.bf16.mxu1 %v9417_v21 }
 0xc29   :  { %v7056_v62 = vld [vmem:[#allocation2 + $0x8] sm:$0xff] }
 0xc2a   :  { %8581 = vmatpush3.bf16.msra.mxu1 %v7056_v62 }
 0xc2d   :  { %8583 = vmatmul.mubr.msk.bf16.vlgmr.msra.gmra.mrb[24].mxu1 %vm106_vm0, %v7054_v22 }
 0xd00   :  { %v7095_v26 = vpop.f32.mrb[24].mxu1 }
 0xd01   :  { %7101 = vst.msk [vmem:[#allocation8] sm:$0xff] %vm106_vm0, %v7095_v26  ;;  %v8584_v49 = vpop.f32.mrb[25].mxu1 }
 0xd02   :  { %v7098_v54 = vpop.f32.mrb[26].mxu1 }
 0xd03   :  { %9396 = shalt.err (!%p9393_p6)
}
 0xd04   :  { %s9397_s10 = scalar_lea.hbm %s10274_s2, 128 }
 0xd05   :  { %p9398_p7 = scmp.ne.s32.totalorder %s10274_s2, %s9397_s10  ;;  %p9401_p8 = scmp.lt.u32.totalorder %s9397_s10, %s10274_s2 }
 0xd07   :  { %p9403_p9 = pnand %p9401_p8, %p9398_p7 }
 0xd09   :  { %9406 = shalt.err (!%p9403_p9)
}
 0xd0a   :  { %7111 = dma.vmem_to_hbm [thread:$0]  %s7109_s6, 128, %s10274_s2, [#allocation5]   ;;  %v8585_v21 = vpop.f32.mrb[27].mxu1 }
 0xd0b   :  { %9411 = dma.done.wait [#allocation5], 128  }
 0xd0c   :  { %9412 = vsyncadd [#allocation5], 4294967168 }
 0xd0d   :  { %7115 = vsyncpa [#allocation4], 1 }
 0xd0e   :  { %7116 = vsyncpa [#allocation7], 1 }
 0xd0f   :  { %7117 = vsyncpa [#allocation5], 1 }

</bundles_post_ra>
